<compile_context>
chip_gen: v7x
topology: tpu7x:2x2x1
jax: 0.10.0
libtpu: 0.0.40
codegen_flags: <defaults>
</compile_context>

<pallas_src>
import functools

import jax
import jax.numpy as jnp
from jax.experimental import pallas as pl
from jax.experimental.pallas import tpu as pltpu

NEG_SLOPE = 0.2
BN_EPS = 1e-5
# f32 operands: exact parity with a float32 reference; flip to jnp.bfloat16 for
# production-size throughput if desired.
MXU_DTYPE = jnp.float32


# --------------------------------- kernels -----------------------------------

def _leaky(x):
    return jnp.where(x > 0, x, NEG_SLOPE * x)


def _bn_leaky_epilogue(acc, g_ref, be_ref):
    """Train-mode BatchNorm (biased batch stats over the whole-M tile) + LeakyReLU,
    computed directly on the f32 conv accumulator (rows = channels, lanes = M)."""
    m = acc.shape[1]
    mean = jnp.sum(acc, axis=1, keepdims=True) * (1.0 / m)
    var = jnp.sum(acc * acc, axis=1, keepdims=True) * (1.0 / m) - mean * mean
    var = jnp.maximum(var, 0.0)                        # guard f32 cancellation
    scale = g_ref[...] * jax.lax.rsqrt(var + BN_EPS)   # EUP
    return _leaky((acc - mean) * scale + be_ref[...])


def _conv_act_kernel(w_ref, c_ref, b_ref, y_ref, *, act):
    """y(Cout, tm) = act(W(Cout, K) @ colsT(K, tm) + b) — lane-dense stores."""
    acc = jnp.dot(w_ref[...], c_ref[...], preferred_element_type=jnp.float32)
    acc = acc + b_ref[...]
    if act == "leaky":
        acc = _leaky(acc)
    elif act == "sigmoid":
        acc = pl.reciprocal(1.0 + jnp.exp(-acc), approx=False)
    y_ref[...] = acc.astype(y_ref.dtype)


def _conv_bn_leaky_kernel(w_ref, c_ref, b_ref, g_ref, be_ref, y_ref):
    """Conv-GEMM + bias + full in-epilogue BatchNorm + LeakyReLU (whole-M tile)."""
    acc = jnp.dot(w_ref[...], c_ref[...], preferred_element_type=jnp.float32)
    y_ref[...] = _bn_leaky_epilogue(acc + b_ref[...], g_ref, be_ref).astype(y_ref.dtype)


def _conv_bn_leaky_head_kernel(w_ref, c_ref, b_ref, g_ref, be_ref,
                               w5_ref, sel_ref, b5_ref, o_ref):
    """Layer 4 + layer 5 fused.

    Layer 4: conv + bias + BatchNorm + LeakyReLU on the f32 accumulator.
    Layer 5: on a 4x4 map the k=4 / pad=0 / stride=2 conv has exactly one output
    position per sample, so it reduces to:  elementwise multiply of y4 with the
    lane-tiled layer-5 weights, a block-diagonal selector matmul (per-sample
    lane-segment sum), a sublane sum over channels, + bias, sigmoid.  The
    layer-4 activation never leaves vregs / VMEM."""
    acc = jnp.dot(w_ref[...], c_ref[...], preferred_element_type=jnp.float32)
    y4 = _bn_leaky_epilogue(acc + b_ref[...], g_ref, be_ref)           # (C4, N*16)
    prod = y4 * w5_ref[...]                                            # VPU
    t = jnp.dot(prod, sel_ref[...], preferred_element_type=jnp.float32)  # (C4, N)
    z = jnp.sum(t, axis=0, keepdims=True) + b5_ref[...]                # (1, N)
    o_ref[...] = pl.reciprocal(1.0 + jnp.exp(-z), approx=False).astype(o_ref.dtype)


# -------------------------------- wrappers ------------------------------------

def _num_tensorcores():
    """Best-effort TensorCores per device (v7x: 2, v5e/v6e: 1); safe fallback 1."""
    try:
        return max(1, int(getattr(jax.devices()[0], "num_cores", 1) or 1))
    except Exception:
        return 1


def _compiler_params(block_bytes):
    # Explicit VMEM budget: ~2x (double-buffer) the live block footprint + slack,
    # floored at 16 MiB, capped under v7x's 64 MiB per-TC physical VMEM.
    limit = int(min(64 << 20, max(16 << 20, 2 * block_bytes + (4 << 20))))
    return pltpu.CompilerParams(dimension_semantics=("parallel",),
                                vmem_limit_bytes=limit)


def _col2d(v):
    return v.reshape(-1, 1).astype(jnp.float32)


def conv_act(w2d, colsT, bias, *, act, out_dtype, num_cores=1):
    """y = act(W @ colsT + b). Largest-tile policy: T=1 (whole M) on single-TC
    chips; T=2 'parallel' only when a second TensorCore exists and both halves
    stay lane-dense (>=256 lanes, multiple of 128)."""
    cout, K = w2d.shape
    M = colsT.shape[1]
    T = 2 if (num_cores > 1 and M % 256 == 0 and M >= 512) else 1
    tm = M // T
    itb = jnp.dtype(MXU_DTYPE).itemsize
    oib = jnp.dtype(out_dtype).itemsize
    block_bytes = cout * K * itb + K * tm * itb + cout * 4 + cout * tm * oib
    total_bytes = cout * K * itb + K * M * itb + cout * 4 + cout * M * oib
    return pl.pallas_call(
        functools.partial(_conv_act_kernel, act=act),
        out_shape=jax.ShapeDtypeStruct((cout, M), out_dtype),
        grid=(T,),
        in_specs=[pl.BlockSpec((cout, K), lambda i: (0, 0)),   # weights resident
                  pl.BlockSpec((K, tm), lambda i: (0, i)),     # cols tile
                  pl.BlockSpec((cout, 1), lambda i: (0, 0))],  # bias resident
        out_specs=pl.BlockSpec((cout, tm), lambda i: (0, i)),
        compiler_params=_compiler_params(block_bytes),
        cost_estimate=pl.CostEstimate(flops=2 * cout * K * M + 2 * cout * M,
                                      transcendentals=(M if act == "sigmoid" else 0),
                                      bytes_accessed=total_bytes),
    )(w2d, colsT, _col2d(bias))


def conv_bn_leaky(w2d, colsT, bias, gamma, beta, *, out_dtype):
    """Single whole-M tile: conv + bias + full train-mode BN + LeakyReLU, one call."""
    cout, K = w2d.shape
    M = colsT.shape[1]
    itb = jnp.dtype(MXU_DTYPE).itemsize
    oib = jnp.dtype(out_dtype).itemsize
    block_bytes = cout * K * itb + K * M * itb + 3 * cout * 4 + cout * M * oib
    # TODO(synk): for production M too large for one VMEM tile, re-introduce a
    # two-pass BN path with partial stats reduced in-kernel (review item 6).
    return pl.pallas_call(
        _conv_bn_leaky_kernel,
        out_shape=jax.ShapeDtypeStruct((cout, M), out_dtype),
        grid=(1,),
        in_specs=[pl.BlockSpec((cout, K), lambda i: (0, 0)),
                  pl.BlockSpec((K, M), lambda i: (0, 0)),
                  pl.BlockSpec((cout, 1), lambda i: (0, 0)),
                  pl.BlockSpec((cout, 1), lambda i: (0, 0)),
                  pl.BlockSpec((cout, 1), lambda i: (0, 0))],
        out_specs=pl.BlockSpec((cout, M), lambda i: (0, 0)),
        compiler_params=_compiler_params(block_bytes),
        cost_estimate=pl.CostEstimate(flops=2 * cout * K * M + 10 * cout * M,
                                      transcendentals=cout,
                                      bytes_accessed=block_bytes),
    )(w2d, colsT, _col2d(bias), _col2d(gamma), _col2d(beta))


def conv_bn_leaky_head(w2d, colsT, bias, gamma, beta, w5map, sel, b5):
    """Fused layer 4 (+BN+LeakyReLU) and layer 5 (+sigmoid) in one call."""
    cout, K = w2d.shape
    M = colsT.shape[1]
    N = sel.shape[1]
    itb = jnp.dtype(MXU_DTYPE).itemsize
    block_bytes = (cout * K * itb + K * M * itb + 3 * cout * 4
                   + cout * M * 4 + M * N * 4 + 4 + N * 4)
    return pl.pallas_call(
        _conv_bn_leaky_head_kernel,
        out_shape=jax.ShapeDtypeStruct((1, N), jnp.float32),
        grid=(1,),
        in_specs=[pl.BlockSpec((cout, K), lambda i: (0, 0)),
                  pl.BlockSpec((K, M), lambda i: (0, 0)),
                  pl.BlockSpec((cout, 1), lambda i: (0, 0)),
                  pl.BlockSpec((cout, 1), lambda i: (0, 0)),
                  pl.BlockSpec((cout, 1), lambda i: (0, 0)),
                  pl.BlockSpec((cout, M), lambda i: (0, 0)),   # lane-tiled w5
                  pl.BlockSpec((M, N), lambda i: (0, 0)),      # selector
                  pl.BlockSpec((1, 1), lambda i: (0, 0))],     # b5
        out_specs=pl.BlockSpec((1, N), lambda i: (0, 0)),
        compiler_params=_compiler_params(block_bytes),
        cost_estimate=pl.CostEstimate(
            flops=2 * cout * K * M + 10 * cout * M + 2 * cout * M * N,
            transcendentals=cout + N,
            bytes_accessed=block_bytes),
    )(w2d, colsT, _col2d(bias), _col2d(gamma), _col2d(beta),
      w5map.astype(jnp.float32), sel.astype(jnp.float32),
      b5.reshape(1, 1).astype(jnp.float32))


# ------------------------------ conv plumbing ---------------------------------

def _w2d(w):
    """(Cout, Cin, k, k) -> (Cout, k*k*Cin), columns ordered (kh, kw, cin)."""
    cout, cin, k, _ = w.shape
    return w.transpose(0, 2, 3, 1).reshape(cout, k * k * cin).astype(MXU_DTYPE)


def im2col_t(x, k, stride, pad):
    """x: (C, N, H, W) -> colsT: (k*k*C, N*Ho*Wo), rows ordered (kh, kw, c).

    TODO(synk): tap extraction stays in XLA — the k*k taps are strided windows
    of the un-expanded activation that cannot be expressed as rectangular
    BlockSpec windows, and in-kernel strided/relayout reads do not lower
    reliably; at these shapes the expanded cols buffer is only tens of KB.
    """
    C, N, H, W = x.shape
    Ho = (H + 2 * pad - k) // stride + 1
    Wo = (W + 2 * pad - k) // stride + 1
    xp = jnp.pad(x, ((0, 0), (0, 0), (pad, pad), (pad, pad))) if pad else x
    taps = [xp[:, :, kh:kh + stride * (Ho - 1) + 1:stride,
                     kw:kw + stride * (Wo - 1) + 1:stride]
            for kh in range(k) for kw in range(k)]
    colsT = jnp.concatenate(taps, axis=0).reshape(k * k * C, N * Ho * Wo)
    return colsT.astype(MXU_DTYPE), (N, Ho, Wo)


# ----------------------------- full discriminator -----------------------------

def discriminator_forward(x, params, *, num_cores=1):
    # One-time layout change NCHW -> (C, N, H, W); each layer's (Cout, N*Ho*Wo)
    # output *is* the next layer's activation (free reshape).
    a = jnp.transpose(x, (1, 0, 2, 3)).astype(MXU_DTYPE)

    # Layer 1: conv + bias + LeakyReLU fused in the GEMM epilogue.
    cols, (N, Ho, Wo) = im2col_t(a, 4, 2, 1)
    y = conv_act(_w2d(params["w1"]), cols, params["b1"],
                 act="leaky", out_dtype=MXU_DTYPE, num_cores=num_cores)
    a = y.reshape(-1, N, Ho, Wo)

    # Layers 2-3: conv + bias + full train-mode BatchNorm + LeakyReLU, one call each.
    for i in (2, 3):
        cols, (N, Ho, Wo) = im2col_t(a, 4, 2, 1)
        y = conv_bn_leaky(_w2d(params[f"w{i}"]), cols, params[f"b{i}"],
                          params[f"g{i}"], params[f"be{i}"], out_dtype=MXU_DTYPE)
        a = y.reshape(-1, N, Ho, Wo)

    # Layer 4 (+ fused layer 5): when layer-4's output map is 4x4, layer 5's
    # k=4 / pad=0 / stride=2 conv has exactly one output position per sample,
    # so conv5 + sigmoid are appended to the layer-4 epilogue in one call.
    cols, (N, Ho, Wo) = im2col_t(a, 4, 2, 1)
    if Ho == 4 and Wo == 4:
        c4 = params["w4"].shape[0]
        w5map = jnp.tile(params["w5"].reshape(c4, Ho * Wo), (1, N))       # (C4, N*16)
        sel = jnp.repeat(jnp.eye(N, dtype=jnp.float32), Ho * Wo, axis=0)  # (N*16, N)
        out = conv_bn_leaky_head(_w2d(params["w4"]), cols, params["b4"],
                                 params["g4"], params["be4"],
                                 w5map, sel, params["b5"])
        return out.reshape(-1)

    # Fallback (non-64x64 inputs): un-fused layer 4, then layer 5 + sigmoid.
    y = conv_bn_leaky(_w2d(params["w4"]), cols, params["b4"],
                      params["g4"], params["be4"], out_dtype=MXU_DTYPE)
    a = y.reshape(-1, N, Ho, Wo)
    cols, _ = im2col_t(a, 4, 2, 0)
    y = conv_act(_w2d(params["w5"]), cols, params["b5"],
                 act="sigmoid", out_dtype=jnp.float32, num_cores=1)
    return y.reshape(-1)


# ------------------------------ reference & init ------------------------------

def reference_forward(x, params):
    """Pure-XLA float32 reference matching the PyTorch module (train-mode BN)."""
    def conv(h, w, b, stride, pad):
        y = jax.lax.conv_general_dilated(
            h, w, window_strides=(stride, stride),
            padding=[(pad, pad), (pad, pad)],
            dimension_numbers=("NCHW", "OIHW", "NCHW"),
            precision=jax.lax.Precision.HIGHEST)
        return y + b.reshape(1, -1, 1, 1)

    def bn(h, g, be):
        mean = jnp.mean(h, axis=(0, 2, 3), keepdims=True)
        var = jnp.mean((h - mean) ** 2, axis=(0, 2, 3), keepdims=True)
        return ((h - mean) * jax.lax.rsqrt(var + BN_EPS) * g.reshape(1, -1, 1, 1)
                + be.reshape(1, -1, 1, 1))

    def lrelu(h):
        return jnp.where(h > 0, h, NEG_SLOPE * h)

    h = lrelu(conv(x, params["w1"], params["b1"], 2, 1))
    for i in (2, 3, 4):
        h = lrelu(bn(conv(h, params[f"w{i}"], params[f"b{i}"], 2, 1),
                     params[f"g{i}"], params[f"be{i}"]))
    h = conv(h, params["w5"], params["b5"], 2, 0)
    return jax.nn.sigmoid(h).reshape(-1)


def init_params(key, img_channels, feature_d):
    chans = [img_channels, feature_d, feature_d * 2, feature_d * 4, feature_d * 8, 1]
    params = {}
    for i in range(1, 6):
        cin, cout = chans[i - 1], chans[i]
        key, k1, k2 = jax.random.split(key, 3)
        params[f"w{i}"] = 0.05 * jax.random.normal(k1, (cout, cin, 4, 4), jnp.float32)
        params[f"b{i}"] = 0.05 * jax.random.normal(k2, (cout,), jnp.float32)
    for i in (2, 3, 4):
        c = chans[i]
        key, k1, k2 = jax.random.split(key, 3)
        params[f"g{i}"] = 1.0 + 0.1 * jax.random.normal(k1, (c,), jnp.float32)
        params[f"be{i}"] = 0.1 * jax.random.normal(k2, (c,), jnp.float32)
    return params


if __name__ == "__main__":
    key = jax.random.PRNGKey(0)
    k_x, k_p = jax.random.split(key)

    batch, img_channels, feature_d, spatial = 2, 3, 8, 64   # 64x64 -> final 1x1
    x = jax.random.normal(k_x, (batch, img_channels, spatial, spatial), jnp.float32)
    params = init_params(k_p, img_channels, feature_d)

    fwd = jax.jit(functools.partial(discriminator_forward,
                                    num_cores=_num_tensorcores()))
    out = jax.block_until_ready(fwd(x, params))

    assert out.shape == (batch,), out.shape
    assert bool(jnp.all((out >= 0.0) & (out <= 1.0)))

    ref = jax.block_until_ready(jax.jit(reference_forward)(x, params))
    max_err = float(jnp.max(jnp.abs(out - ref)))
    assert max_err < 2e-2, max_err

    print("KERNEL_OK")
</pallas_src>

<mosaic_0001>
module attributes {stable_mosaic.version = 11 : i64} {
  func.func @_conv_act_kernel(%arg0: i32, %arg1: memref<8x48xf32, #tpu.memory_space<vmem>>, %arg2: memref<48x2048xf32, #tpu.memory_space<vmem>>, %arg3: memref<8x1xf32, #tpu.memory_space<vmem>>, %arg4: memref<8x2048xf32, #tpu.memory_space<vmem>>) attributes {dimension_semantics = [#tpu.dimension_semantics<parallel>], iteration_bounds = array<i64: 1>, scalar_prefetch = 0 : i64, scratch_operands = 0 : i64, tpu.core_type = #tpu.core_type<tc>, window_params = [{pipeline_mode = #tpu.pipeline_mode<synchronous>, transform_indices = @transform_0, window_bounds = array<i64: 8, 48>}, {transform_indices = @transform_1, window_bounds = array<i64: 48, 2048>}, {pipeline_mode = #tpu.pipeline_mode<synchronous>, transform_indices = @transform_2, window_bounds = array<i64: 8, 1>}, {transform_indices = @transform_3, window_bounds = array<i64: 8, 2048>}]} {
    %c0 = arith.constant 0 : index
    %c0_0 = arith.constant 0 : index
    %0 = vector.load %arg1[%c0, %c0_0] : memref<8x48xf32, #tpu.memory_space<vmem>>, vector<8x48xf32>
    %c0_1 = arith.constant 0 : index
    %c0_2 = arith.constant 0 : index
    %1 = vector.load %arg2[%c0_1, %c0_2] : memref<48x2048xf32, #tpu.memory_space<vmem>>, vector<48x2048xf32>
    %cst = arith.constant dense<0.000000e+00> : vector<8x2048xf32>
    %2 = tpu.matmul %0, %1, %cst {dimension_numbers = #tpu.dot_dimension_numbers<[1], [0], [0], [1], [0, 0, 1, 1], [], []>} : vector<8x48xf32>, vector<48x2048xf32>, vector<8x2048xf32> -> vector<8x2048xf32>
    %c0_3 = arith.constant 0 : index
    %c0_4 = arith.constant 0 : index
    %3 = vector.load %arg3[%c0_3, %c0_4] : memref<8x1xf32, #tpu.memory_space<vmem>>, vector<8x1xf32>
    %4 = vector.broadcast %3 : vector<8x1xf32> to vector<8x2048xf32>
    %5 = arith.addf %2, %4 : vector<8x2048xf32>
    %cst_5 = arith.constant 0.000000e+00 : f32
    %6 = vector.broadcast %cst_5 : f32 to vector<8x2048xf32>
    %7 = arith.cmpf ogt, %5, %6 : vector<8x2048xf32>
    %cst_6 = arith.constant 2.000000e-01 : f32
    %8 = vector.broadcast %cst_6 : f32 to vector<8x2048xf32>
    %9 = arith.mulf %8, %5 : vector<8x2048xf32>
    %10 = arith.select %7, %5, %9 : vector<8x2048xi1>, vector<8x2048xf32>
    %c0_7 = arith.constant 0 : index
    %c0_8 = arith.constant 0 : index
    %11 = vector.load %arg4[%c0_7, %c0_8] : memref<8x2048xf32, #tpu.memory_space<vmem>>, vector<8x2048xf32>
    tpu.vector_store %arg4[%c0_7, %c0_8], %10 {strides = array<i32>} : memref<8x2048xf32, #tpu.memory_space<vmem>>, vector<8x2048xf32>,
    return
  }
  func.func @transform_0(%arg0: i32) -> (i32, i32) {
    %c0_i32 = arith.constant 0 : i32
    %c0_i32_0 = arith.constant 0 : i32
    %c0_i32_1 = arith.constant 0 : i32
    return %c0_i32, %c0_i32_0 : i32, i32
  }
  func.func @transform_1(%arg0: i32) -> (i32, i32) {
    %c0_i32 = arith.constant 0 : i32
    %c0_i32_0 = arith.constant 0 : i32
    return %c0_i32, %arg0 : i32, i32
  }
  func.func @transform_2(%arg0: i32) -> (i32, i32) {
    %c0_i32 = arith.constant 0 : i32
    %c0_i32_0 = arith.constant 0 : i32
    %c0_i32_1 = arith.constant 0 : i32
    return %c0_i32, %c0_i32_0 : i32, i32
  }
  func.func @transform_3(%arg0: i32) -> (i32, i32) {
    %c0_i32 = arith.constant 0 : i32
    %c0_i32_0 = arith.constant 0 : i32
    return %c0_i32, %arg0 : i32, i32
  }
}

module attributes {stable_mosaic.version = 11 : i64} {
  func.func @_conv_bn_leaky_kernel(%arg0: i32, %arg1: memref<16x128xf32, #tpu.memory_space<vmem>>, %arg2: memref<128x512xf32, #tpu.memory_space<vmem>>, %arg3: memref<16x1xf32, #tpu.memory_space<vmem>>, %arg4: memref<16x1xf32, #tpu.memory_space<vmem>>, %arg5: memref<16x1xf32, #tpu.memory_space<vmem>>, %arg6: memref<16x512xf32, #tpu.memory_space<vmem>>) attributes {dimension_semantics = [#tpu.dimension_semantics<parallel>], iteration_bounds = array<i64: 1>, scalar_prefetch = 0 : i64, scratch_operands = 0 : i64, tpu.core_type = #tpu.core_type<tc>, window_params = [{pipeline_mode = #tpu.pipeline_mode<synchronous>, transform_indices = @transform_0, window_bounds = array<i64: 16, 128>}, {pipeline_mode = #tpu.pipeline_mode<synchronous>, transform_indices = @transform_1, window_bounds = array<i64: 128, 512>}, {pipeline_mode = #tpu.pipeline_mode<synchronous>, transform_indices = @transform_2, window_bounds = array<i64: 16, 1>}, {pipeline_mode = #tpu.pipeline_mode<synchronous>, transform_indices = @transform_3, window_bounds = array<i64: 16, 1>}, {pipeline_mode = #tpu.pipeline_mode<synchronous>, transform_indices = @transform_4, window_bounds = array<i64: 16, 1>}, {pipeline_mode = #tpu.pipeline_mode<synchronous>, transform_indices = @transform_5, window_bounds = array<i64: 16, 512>}]} {
    %c0 = arith.constant 0 : index
    %c0_0 = arith.constant 0 : index
    %0 = vector.load %arg1[%c0, %c0_0] : memref<16x128xf32, #tpu.memory_space<vmem>>, vector<16x128xf32>
    %c0_1 = arith.constant 0 : index
    %c0_2 = arith.constant 0 : index
    %1 = vector.load %arg2[%c0_1, %c0_2] : memref<128x512xf32, #tpu.memory_space<vmem>>, vector<128x512xf32>
    %cst = arith.constant dense<0.000000e+00> : vector<16x512xf32>
    %2 = tpu.matmul %0, %1, %cst {dimension_numbers = #tpu.dot_dimension_numbers<[1], [0], [0], [1], [0, 0, 1, 1], [], []>} : vector<16x128xf32>, vector<128x512xf32>, vector<16x512xf32> -> vector<16x512xf32>
    %c0_3 = arith.constant 0 : index
    %c0_4 = arith.constant 0 : index
    %3 = vector.load %arg3[%c0_3, %c0_4] : memref<16x1xf32, #tpu.memory_space<vmem>>, vector<16x1xf32>
    %4 = vector.broadcast %3 : vector<16x1xf32> to vector<16x512xf32>
    %5 = arith.addf %2, %4 : vector<16x512xf32>
    %cst_5 = arith.constant dense<0.000000e+00> : vector<16xf32>
    %6 = vector.multi_reduction <add>, %5, %cst_5 [1] : vector<16x512xf32> to vector<16xf32>
    %7 = vector.shape_cast %6 : vector<16xf32> to vector<16x1xf32>
    %cst_6 = arith.constant 0.001953125 : f32
    %8 = vector.broadcast %cst_6 : f32 to vector<16x1xf32>
    %9 = arith.mulf %7, %8 : vector<16x1xf32>
    %10 = arith.mulf %5, %5 : vector<16x512xf32>
    %cst_7 = arith.constant dense<0.000000e+00> : vector<16xf32>
    %11 = vector.multi_reduction <add>, %10, %cst_7 [1] : vector<16x512xf32> to vector<16xf32>
    %12 = vector.shape_cast %11 : vector<16xf32> to vector<16x1xf32>
    %cst_8 = arith.constant 0.001953125 : f32
    %13 = vector.broadcast %cst_8 : f32 to vector<16x1xf32>
    %14 = arith.mulf %12, %13 : vector<16x1xf32>
    %15 = arith.mulf %9, %9 : vector<16x1xf32>
    %16 = arith.subf %14, %15 : vector<16x1xf32>
    %cst_9 = arith.constant 0.000000e+00 : f32
    %17 = vector.broadcast %cst_9 : f32 to vector<16x1xf32>
    %18 = arith.maximumf %16, %17 : vector<16x1xf32>
    %c0_10 = arith.constant 0 : index
    %c0_11 = arith.constant 0 : index
    %19 = vector.load %arg4[%c0_10, %c0_11] : memref<16x1xf32, #tpu.memory_space<vmem>>, vector<16x1xf32>
    %cst_12 = arith.constant 9.99999974E-6 : f32
    %20 = vector.broadcast %cst_12 : f32 to vector<16x1xf32>
    %21 = arith.addf %18, %20 : vector<16x1xf32>
    %22 = math.rsqrt %21 : vector<16x1xf32>
    %23 = arith.mulf %19, %22 : vector<16x1xf32>
    %24 = vector.broadcast %9 : vector<16x1xf32> to vector<16x512xf32>
    %25 = arith.subf %5, %24 : vector<16x512xf32>
    %26 = vector.broadcast %23 : vector<16x1xf32> to vector<16x512xf32>
    %27 = arith.mulf %25, %26 : vector<16x512xf32>
    %c0_13 = arith.constant 0 : index
    %c0_14 = arith.constant 0 : index
    %28 = vector.load %arg5[%c0_13, %c0_14] : memref<16x1xf32, #tpu.memory_space<vmem>>, vector<16x1xf32>
    %29 = vector.broadcast %28 : vector<16x1xf32> to vector<16x512xf32>
    %30 = arith.addf %27, %29 : vector<16x512xf32>
    %cst_15 = arith.constant 0.000000e+00 : f32
    %31 = vector.broadcast %cst_15 : f32 to vector<16x512xf32>
    %32 = arith.cmpf ogt, %30, %31 : vector<16x512xf32>
    %cst_16 = arith.constant 2.000000e-01 : f32
    %33 = vector.broadcast %cst_16 : f32 to vector<16x512xf32>
    %34 = arith.mulf %33, %30 : vector<16x512xf32>
    %35 = arith.select %32, %30, %34 : vector<16x512xi1>, vector<16x512xf32>
    %c0_17 = arith.constant 0 : index
    %c0_18 = arith.constant 0 : index
    %36 = vector.load %arg6[%c0_17, %c0_18] : memref<16x512xf32, #tpu.memory_space<vmem>>, vector<16x512xf32>
    tpu.vector_store %arg6[%c0_17, %c0_18], %35 {strides = array<i32>} : memref<16x512xf32, #tpu.memory_space<vmem>>, vector<16x512xf32>,
    return
  }
  func.func @transform_0(%arg0: i32) -> (i32, i32) {
    %c0_i32 = arith.constant 0 : i32
    %c0_i32_0 = arith.constant 0 : i32
    %c0_i32_1 = arith.constant 0 : i32
    return %c0_i32, %c0_i32_0 : i32, i32
  }
  func.func @transform_1(%arg0: i32) -> (i32, i32) {
    %c0_i32 = arith.constant 0 : i32
    %c0_i32_0 = arith.constant 0 : i32
    %c0_i32_1 = arith.constant 0 : i32
    return %c0_i32, %c0_i32_0 : i32, i32
  }
  func.func @transform_2(%arg0: i32) -> (i32, i32) {
    %c0_i32 = arith.constant 0 : i32
    %c0_i32_0 = arith.constant 0 : i32
    %c0_i32_1 = arith.constant 0 : i32
    return %c0_i32, %c0_i32_0 : i32, i32
  }
  func.func @transform_3(%arg0: i32) -> (i32, i32) {
    %c0_i32 = arith.constant 0 : i32
    %c0_i32_0 = arith.constant 0 : i32
    %c0_i32_1 = arith.constant 0 : i32
    return %c0_i32, %c0_i32_0 : i32, i32
  }
  func.func @transform_4(%arg0: i32) -> (i32, i32) {
    %c0_i32 = arith.constant 0 : i32
    %c0_i32_0 = arith.constant 0 : i32
    %c0_i32_1 = arith.constant 0 : i32
    return %c0_i32, %c0_i32_0 : i32, i32
  }
  func.func @transform_5(%arg0: i32) -> (i32, i32) {
    %c0_i32 = arith.constant 0 : i32
    %c0_i32_0 = arith.constant 0 : i32
    %c0_i32_1 = arith.constant 0 : i32
    return %c0_i32, %c0_i32_0 : i32, i32
  }
}

module attributes {stable_mosaic.version = 11 : i64} {
  func.func @_conv_bn_leaky_kernel(%arg0: i32, %arg1: memref<32x256xf32, #tpu.memory_space<vmem>>, %arg2: memref<256x128xf32, #tpu.memory_space<vmem>>, %arg3: memref<32x1xf32, #tpu.memory_space<vmem>>, %arg4: memref<32x1xf32, #tpu.memory_space<vmem>>, %arg5: memref<32x1xf32, #tpu.memory_space<vmem>>, %arg6: memref<32x128xf32, #tpu.memory_space<vmem>>) attributes {dimension_semantics = [#tpu.dimension_semantics<parallel>], iteration_bounds = array<i64: 1>, scalar_prefetch = 0 : i64, scratch_operands = 0 : i64, tpu.core_type = #tpu.core_type<tc>, window_params = [{pipeline_mode = #tpu.pipeline_mode<synchronous>, transform_indices = @transform_0, window_bounds = array<i64: 32, 256>}, {pipeline_mode = #tpu.pipeline_mode<synchronous>, transform_indices = @transform_1, window_bounds = array<i64: 256, 128>}, {pipeline_mode = #tpu.pipeline_mode<synchronous>, transform_indices = @transform_2, window_bounds = array<i64: 32, 1>}, {pipeline_mode = #tpu.pipeline_mode<synchronous>, transform_indices = @transform_3, window_bounds = array<i64: 32, 1>}, {pipeline_mode = #tpu.pipeline_mode<synchronous>, transform_indices = @transform_4, window_bounds = array<i64: 32, 1>}, {pipeline_mode = #tpu.pipeline_mode<synchronous>, transform_indices = @transform_5, window_bounds = array<i64: 32, 128>}]} {
    %c0 = arith.constant 0 : index
    %c0_0 = arith.constant 0 : index
    %0 = vector.load %arg1[%c0, %c0_0] : memref<32x256xf32, #tpu.memory_space<vmem>>, vector<32x256xf32>
    %c0_1 = arith.constant 0 : index
    %c0_2 = arith.constant 0 : index
    %1 = vector.load %arg2[%c0_1, %c0_2] : memref<256x128xf32, #tpu.memory_space<vmem>>, vector<256x128xf32>
    %cst = arith.constant dense<0.000000e+00> : vector<32x128xf32>
    %2 = tpu.matmul %0, %1, %cst {dimension_numbers = #tpu.dot_dimension_numbers<[1], [0], [0], [1], [0, 0, 1, 1], [], []>} : vector<32x256xf32>, vector<256x128xf32>, vector<32x128xf32> -> vector<32x128xf32>
    %c0_3 = arith.constant 0 : index
    %c0_4 = arith.constant 0 : index
    %3 = vector.load %arg3[%c0_3, %c0_4] : memref<32x1xf32, #tpu.memory_space<vmem>>, vector<32x1xf32>
    %4 = vector.broadcast %3 : vector<32x1xf32> to vector<32x128xf32>
    %5 = arith.addf %2, %4 : vector<32x128xf32>
    %cst_5 = arith.constant dense<0.000000e+00> : vector<32xf32>
    %6 = vector.multi_reduction <add>, %5, %cst_5 [1] : vector<32x128xf32> to vector<32xf32>
    %7 = vector.shape_cast %6 : vector<32xf32> to vector<32x1xf32>
    %cst_6 = arith.constant 7.812500e-03 : f32
    %8 = vector.broadcast %cst_6 : f32 to vector<32x1xf32>
    %9 = arith.mulf %7, %8 : vector<32x1xf32>
    %10 = arith.mulf %5, %5 : vector<32x128xf32>
    %cst_7 = arith.constant dense<0.000000e+00> : vector<32xf32>
    %11 = vector.multi_reduction <add>, %10, %cst_7 [1] : vector<32x128xf32> to vector<32xf32>
    %12 = vector.shape_cast %11 : vector<32xf32> to vector<32x1xf32>
    %cst_8 = arith.constant 7.812500e-03 : f32
    %13 = vector.broadcast %cst_8 : f32 to vector<32x1xf32>
    %14 = arith.mulf %12, %13 : vector<32x1xf32>
    %15 = arith.mulf %9, %9 : vector<32x1xf32>
    %16 = arith.subf %14, %15 : vector<32x1xf32>
    %cst_9 = arith.constant 0.000000e+00 : f32
    %17 = vector.broadcast %cst_9 : f32 to vector<32x1xf32>
    %18 = arith.maximumf %16, %17 : vector<32x1xf32>
    %c0_10 = arith.constant 0 : index
    %c0_11 = arith.constant 0 : index
    %19 = vector.load %arg4[%c0_10, %c0_11] : memref<32x1xf32, #tpu.memory_space<vmem>>, vector<32x1xf32>
    %cst_12 = arith.constant 9.99999974E-6 : f32
    %20 = vector.broadcast %cst_12 : f32 to vector<32x1xf32>
    %21 = arith.addf %18, %20 : vector<32x1xf32>
    %22 = math.rsqrt %21 : vector<32x1xf32>
    %23 = arith.mulf %19, %22 : vector<32x1xf32>
    %24 = vector.broadcast %9 : vector<32x1xf32> to vector<32x128xf32>
    %25 = arith.subf %5, %24 : vector<32x128xf32>
    %26 = vector.broadcast %23 : vector<32x1xf32> to vector<32x128xf32>
    %27 = arith.mulf %25, %26 : vector<32x128xf32>
    %c0_13 = arith.constant 0 : index
    %c0_14 = arith.constant 0 : index
    %28 = vector.load %arg5[%c0_13, %c0_14] : memref<32x1xf32, #tpu.memory_space<vmem>>, vector<32x1xf32>
    %29 = vector.broadcast %28 : vector<32x1xf32> to vector<32x128xf32>
    %30 = arith.addf %27, %29 : vector<32x128xf32>
    %cst_15 = arith.constant 0.000000e+00 : f32
    %31 = vector.broadcast %cst_15 : f32 to vector<32x128xf32>
    %32 = arith.cmpf ogt, %30, %31 : vector<32x128xf32>
    %cst_16 = arith.constant 2.000000e-01 : f32
    %33 = vector.broadcast %cst_16 : f32 to vector<32x128xf32>
    %34 = arith.mulf %33, %30 : vector<32x128xf32>
    %35 = arith.select %32, %30, %34 : vector<32x128xi1>, vector<32x128xf32>
    %c0_17 = arith.constant 0 : index
    %c0_18 = arith.constant 0 : index
    %36 = vector.load %arg6[%c0_17, %c0_18] : memref<32x128xf32, #tpu.memory_space<vmem>>, vector<32x128xf32>
    tpu.vector_store %arg6[%c0_17, %c0_18], %35 {strides = array<i32>} : memref<32x128xf32, #tpu.memory_space<vmem>>, vector<32x128xf32>,
    return
  }
  func.func @transform_0(%arg0: i32) -> (i32, i32) {
    %c0_i32 = arith.constant 0 : i32
    %c0_i32_0 = arith.constant 0 : i32
    %c0_i32_1 = arith.constant 0 : i32
    return %c0_i32, %c0_i32_0 : i32, i32
  }
  func.func @transform_1(%arg0: i32) -> (i32, i32) {
    %c0_i32 = arith.constant 0 : i32
    %c0_i32_0 = arith.constant 0 : i32
    %c0_i32_1 = arith.constant 0 : i32
    return %c0_i32, %c0_i32_0 : i32, i32
  }
  func.func @transform_2(%arg0: i32) -> (i32, i32) {
    %c0_i32 = arith.constant 0 : i32
    %c0_i32_0 = arith.constant 0 : i32
    %c0_i32_1 = arith.constant 0 : i32
    return %c0_i32, %c0_i32_0 : i32, i32
  }
  func.func @transform_3(%arg0: i32) -> (i32, i32) {
    %c0_i32 = arith.constant 0 : i32
    %c0_i32_0 = arith.constant 0 : i32
    %c0_i32_1 = arith.constant 0 : i32
    return %c0_i32, %c0_i32_0 : i32, i32
  }
  func.func @transform_4(%arg0: i32) -> (i32, i32) {
    %c0_i32 = arith.constant 0 : i32
    %c0_i32_0 = arith.constant 0 : i32
    %c0_i32_1 = arith.constant 0 : i32
    return %c0_i32, %c0_i32_0 : i32, i32
  }
  func.func @transform_5(%arg0: i32) -> (i32, i32) {
    %c0_i32 = arith.constant 0 : i32
    %c0_i32_0 = arith.constant 0 : i32
    %c0_i32_1 = arith.constant 0 : i32
    return %c0_i32, %c0_i32_0 : i32, i32
  }
}

module attributes {stable_mosaic.version = 11 : i64} {
  func.func @_conv_bn_leaky_head_kernel(%arg0: i32, %arg1: memref<64x512xf32, #tpu.memory_space<vmem>>, %arg2: memref<512x32xf32, #tpu.memory_space<vmem>>, %arg3: memref<64x1xf32, #tpu.memory_space<vmem>>, %arg4: memref<64x1xf32, #tpu.memory_space<vmem>>, %arg5: memref<64x1xf32, #tpu.memory_space<vmem>>, %arg6: memref<64x32xf32, #tpu.memory_space<vmem>>, %arg7: memref<32x2xf32, #tpu.memory_space<vmem>>, %arg8: memref<1x1xf32, #tpu.memory_space<vmem>>, %arg9: memref<1x2xf32, #tpu.memory_space<vmem>>) attributes {dimension_semantics = [#tpu.dimension_semantics<parallel>], iteration_bounds = array<i64: 1>, scalar_prefetch = 0 : i64, scratch_operands = 0 : i64, tpu.core_type = #tpu.core_type<tc>, window_params = [{pipeline_mode = #tpu.pipeline_mode<synchronous>, transform_indices = @transform_0, window_bounds = array<i64: 64, 512>}, {pipeline_mode = #tpu.pipeline_mode<synchronous>, transform_indices = @transform_1, window_bounds = array<i64: 512, 32>}, {pipeline_mode = #tpu.pipeline_mode<synchronous>, transform_indices = @transform_2, window_bounds = array<i64: 64, 1>}, {pipeline_mode = #tpu.pipeline_mode<synchronous>, transform_indices = @transform_3, window_bounds = array<i64: 64, 1>}, {pipeline_mode = #tpu.pipeline_mode<synchronous>, transform_indices = @transform_4, window_bounds = array<i64: 64, 1>}, {pipeline_mode = #tpu.pipeline_mode<synchronous>, transform_indices = @transform_5, window_bounds = array<i64: 64, 32>}, {pipeline_mode = #tpu.pipeline_mode<synchronous>, transform_indices = @transform_6, window_bounds = array<i64: 32, 2>}, {pipeline_mode = #tpu.pipeline_mode<synchronous>, transform_indices = @transform_7, window_bounds = array<i64: 1, 1>}, {pipeline_mode = #tpu.pipeline_mode<synchronous>, transform_indices = @transform_8, window_bounds = array<i64: 1, 2>}]} {
    %c0 = arith.constant 0 : index
    %c0_0 = arith.constant 0 : index
    %0 = vector.load %arg1[%c0, %c0_0] : memref<64x512xf32, #tpu.memory_space<vmem>>, vector<64x512xf32>
    %c0_1 = arith.constant 0 : index
    %c0_2 = arith.constant 0 : index
    %1 = vector.load %arg2[%c0_1, %c0_2] : memref<512x32xf32, #tpu.memory_space<vmem>>, vector<512x32xf32>
    %cst = arith.constant dense<0.000000e+00> : vector<64x32xf32>
    %2 = tpu.matmul %0, %1, %cst {dimension_numbers = #tpu.dot_dimension_numbers<[1], [0], [0], [1], [0, 0, 1, 1], [], []>} : vector<64x512xf32>, vector<512x32xf32>, vector<64x32xf32> -> vector<64x32xf32>
    %c0_3 = arith.constant 0 : index
    %c0_4 = arith.constant 0 : index
    %3 = vector.load %arg3[%c0_3, %c0_4] : memref<64x1xf32, #tpu.memory_space<vmem>>, vector<64x1xf32>
    %4 = vector.broadcast %3 : vector<64x1xf32> to vector<64x32xf32>
    %5 = arith.addf %2, %4 : vector<64x32xf32>
    %cst_5 = arith.constant dense<0.000000e+00> : vector<64xf32>
    %6 = vector.multi_reduction <add>, %5, %cst_5 [1] : vector<64x32xf32> to vector<64xf32>
    %7 = vector.shape_cast %6 : vector<64xf32> to vector<64x1xf32>
    %cst_6 = arith.constant 3.125000e-02 : f32
    %8 = vector.broadcast %cst_6 : f32 to vector<64x1xf32>
    %9 = arith.mulf %7, %8 : vector<64x1xf32>
    %10 = arith.mulf %5, %5 : vector<64x32xf32>
    %cst_7 = arith.constant dense<0.000000e+00> : vector<64xf32>
    %11 = vector.multi_reduction <add>, %10, %cst_7 [1] : vector<64x32xf32> to vector<64xf32>
    %12 = vector.shape_cast %11 : vector<64xf32> to vector<64x1xf32>
    %cst_8 = arith.constant 3.125000e-02 : f32
    %13 = vector.broadcast %cst_8 : f32 to vector<64x1xf32>
    %14 = arith.mulf %12, %13 : vector<64x1xf32>
    %15 = arith.mulf %9, %9 : vector<64x1xf32>
    %16 = arith.subf %14, %15 : vector<64x1xf32>
    %cst_9 = arith.constant 0.000000e+00 : f32
    %17 = vector.broadcast %cst_9 : f32 to vector<64x1xf32>
    %18 = arith.maximumf %16, %17 : vector<64x1xf32>
    %c0_10 = arith.constant 0 : index
    %c0_11 = arith.constant 0 : index
    %19 = vector.load %arg4[%c0_10, %c0_11] : memref<64x1xf32, #tpu.memory_space<vmem>>, vector<64x1xf32>
    %cst_12 = arith.constant 9.99999974E-6 : f32
    %20 = vector.broadcast %cst_12 : f32 to vector<64x1xf32>
    %21 = arith.addf %18, %20 : vector<64x1xf32>
    %22 = math.rsqrt %21 : vector<64x1xf32>
    %23 = arith.mulf %19, %22 : vector<64x1xf32>
    %24 = vector.broadcast %9 : vector<64x1xf32> to vector<64x32xf32>
    %25 = arith.subf %5, %24 : vector<64x32xf32>
    %26 = vector.broadcast %23 : vector<64x1xf32> to vector<64x32xf32>
    %27 = arith.mulf %25, %26 : vector<64x32xf32>
    %c0_13 = arith.constant 0 : index
    %c0_14 = arith.constant 0 : index
    %28 = vector.load %arg5[%c0_13, %c0_14] : memref<64x1xf32, #tpu.memory_space<vmem>>, vector<64x1xf32>
    %29 = vector.broadcast %28 : vector<64x1xf32> to vector<64x32xf32>
    %30 = arith.addf %27, %29 : vector<64x32xf32>
    %cst_15 = arith.constant 0.000000e+00 : f32
    %31 = vector.broadcast %cst_15 : f32 to vector<64x32xf32>
    %32 = arith.cmpf ogt, %30, %31 : vector<64x32xf32>
    %cst_16 = arith.constant 2.000000e-01 : f32
    %33 = vector.broadcast %cst_16 : f32 to vector<64x32xf32>
    %34 = arith.mulf %33, %30 : vector<64x32xf32>
    %35 = arith.select %32, %30, %34 : vector<64x32xi1>, vector<64x32xf32>
    %c0_17 = arith.constant 0 : index
    %c0_18 = arith.constant 0 : index
    %36 = vector.load %arg6[%c0_17, %c0_18] : memref<64x32xf32, #tpu.memory_space<vmem>>, vector<64x32xf32>
    %37 = arith.mulf %35, %36 : vector<64x32xf32>
    %c0_19 = arith.constant 0 : index
    %c0_20 = arith.constant 0 : index
    %38 = vector.load %arg7[%c0_19, %c0_20] : memref<32x2xf32, #tpu.memory_space<vmem>>, vector<32x2xf32>
    %cst_21 = arith.constant dense<0.000000e+00> : vector<64x2xf32>
    %39 = tpu.matmul %37, %38, %cst_21 {dimension_numbers = #tpu.dot_dimension_numbers<[1], [0], [0], [1], [0, 0, 1, 1], [], []>} : vector<64x32xf32>, vector<32x2xf32>, vector<64x2xf32> -> vector<64x2xf32>
    %cst_22 = arith.constant dense<0.000000e+00> : vector<2xf32>
    %40 = vector.multi_reduction <add>, %39, %cst_22 [0] : vector<64x2xf32> to vector<2xf32>
    %41 = vector.shape_cast %40 : vector<2xf32> to vector<1x2xf32>
    %c0_23 = arith.constant 0 : index
    %c0_24 = arith.constant 0 : index
    %42 = vector.load %arg8[%c0_23, %c0_24] : memref<1x1xf32, #tpu.memory_space<vmem>>, vector<1x1xf32>
    %43 = vector.broadcast %42 : vector<1x1xf32> to vector<1x2xf32>
    %44 = arith.addf %41, %43 : vector<1x2xf32>
    %cst_25 = arith.constant 0.000000e+00 : f32
    %45 = vector.broadcast %cst_25 : f32 to vector<1x2xf32>
    %46 = arith.subf %45, %44 : vector<1x2xf32>
    %47 = math.exp %46 : vector<1x2xf32>
    %cst_26 = arith.constant 1.000000e+00 : f32
    %48 = vector.broadcast %cst_26 : f32 to vector<1x2xf32>
    %49 = arith.addf %48, %47 : vector<1x2xf32>
    %50 = tpu.reciprocal %49 : vector<1x2xf32> -> vector<1x2xf32>
    %c0_27 = arith.constant 0 : index
    %c0_28 = arith.constant 0 : index
    %51 = vector.load %arg9[%c0_27, %c0_28] : memref<1x2xf32, #tpu.memory_space<vmem>>, vector<1x2xf32>
    tpu.vector_store %arg9[%c0_27, %c0_28], %50 {strides = array<i32>} : memref<1x2xf32, #tpu.memory_space<vmem>>, vector<1x2xf32>,
    return
  }
  func.func @transform_0(%arg0: i32) -> (i32, i32) {
    %c0_i32 = arith.constant 0 : i32
    %c0_i32_0 = arith.constant 0 : i32
    %c0_i32_1 = arith.constant 0 : i32
    return %c0_i32, %c0_i32_0 : i32, i32
  }
  func.func @transform_1(%arg0: i32) -> (i32, i32) {
    %c0_i32 = arith.constant 0 : i32
    %c0_i32_0 = arith.constant 0 : i32
    %c0_i32_1 = arith.constant 0 : i32
    return %c0_i32, %c0_i32_0 : i32, i32
  }
  func.func @transform_2(%arg0: i32) -> (i32, i32) {
    %c0_i32 = arith.constant 0 : i32
    %c0_i32_0 = arith.constant 0 : i32
    %c0_i32_1 = arith.constant 0 : i32
    return %c0_i32, %c0_i32_0 : i32, i32
  }
  func.func @transform_3(%arg0: i32) -> (i32, i32) {
    %c0_i32 = arith.constant 0 : i32
    %c0_i32_0 = arith.constant 0 : i32
    %c0_i32_1 = arith.constant 0 : i32
    return %c0_i32, %c0_i32_0 : i32, i32
  }
  func.func @transform_4(%arg0: i32) -> (i32, i32) {
    %c0_i32 = arith.constant 0 : i32
    %c0_i32_0 = arith.constant 0 : i32
    %c0_i32_1 = arith.constant 0 : i32
    return %c0_i32, %c0_i32_0 : i32, i32
  }
  func.func @transform_5(%arg0: i32) -> (i32, i32) {
    %c0_i32 = arith.constant 0 : i32
    %c0_i32_0 = arith.constant 0 : i32
    %c0_i32_1 = arith.constant 0 : i32
    return %c0_i32, %c0_i32_0 : i32, i32
  }
  func.func @transform_6(%arg0: i32) -> (i32, i32) {
    %c0_i32 = arith.constant 0 : i32
    %c0_i32_0 = arith.constant 0 : i32
    %c0_i32_1 = arith.constant 0 : i32
    return %c0_i32, %c0_i32_0 : i32, i32
  }
  func.func @transform_7(%arg0: i32) -> (i32, i32) {
    %c0_i32 = arith.constant 0 : i32
    %c0_i32_0 = arith.constant 0 : i32
    %c0_i32_1 = arith.constant 0 : i32
    return %c0_i32, %c0_i32_0 : i32, i32
  }
  func.func @transform_8(%arg0: i32) -> (i32, i32) {
    %c0_i32 = arith.constant 0 : i32
    %c0_i32_0 = arith.constant 0 : i32
    %c0_i32_1 = arith.constant 0 : i32
    return %c0_i32, %c0_i32_0 : i32, i32
  }
}

</mosaic_0001>

<bundles_post_ra>
// kernel: discriminator_forward.4
= control target key start
LH: loop header
LB: loop body
LE: loop exit
PB: predicated region body
PF: predicated region fallthrough
CT: control target
= control target key end

     0   :  { %v864_v3 = vmov 0.0   ;;  %v865_v8 = vmov 0   ;;  %vm117_vm0 = vcmask 392192   ;;  %s1272_s1 = inlined_call_operand.vmem [shape: f32[48,2048], index: 1, kind: input, shape index: {}]   ;;  %s1273_s0 = inlined_call_operand.vmem [shape: f32[8,48], index: 0, kind: input, shape index: {}]   ;;  %s1274_s2 = inlined_call_operand.vmem [shape: f32[8,1], index: 2, kind: input, shape index: {}]   ;;  %s1275_s3 = inlined_call_operand.vmem [shape: f32[8,2048], index: 3, kind: output, shape index: {}]  }
   0x1   :  { %v16_v0 = vld [vmem:[%s1272_s1 + $0x8] sm:$0xff]  ;;  %v18_v2 = vld [vmem:[%s1272_s1 + $0x18] sm:$0xff]  ;;  %185 = vmatprep.mubr.f32.mxu0 %v864_v3  ;;  %256 = vmatprep.mubr.f32.mxu1 %v864_v3  ;;  %v15_v6 = vld [vmem:[%s1272_s1] sm:$0xff] }
   0x2   :  { %v32_v1 = vld [vmem:[%s1272_s1 + $0x88] sm:$0xff]  ;;  %v34_v5 = vld [vmem:[%s1272_s1 + $0x98] sm:$0xff]  ;;  %v31_v7 = vld [vmem:[%s1272_s1 + $0x80] sm:$0xff]  ;;  %863 = vset.pattern.permute.xlu0 %v865_v8 }
   0x3   :  { %v765_v4 = vpack.c.bf16 %v32_v1, %v16_v0  ;;  %v777_v9 = vpack.c.bf16 %v34_v5, %v18_v2  ;;  %v767_v10 = vpack.c.bf16 %v31_v7, %v15_v6  ;;  %v17_v11 = vld [vmem:[%s1272_s1 + $0x10] sm:$0xff]  ;;  %v48_v13 = vld [vmem:[%s1272_s1 + $0x108] sm:$0xff]  ;;  %v50_v16 = vld [vmem:[%s1272_s1 + $0x118] sm:$0xff] }
   0x4   :  { %v33_v12 = vld [vmem:[%s1272_s1 + $0x90] sm:$0xff]  ;;  %v64_v15 = vld [vmem:[%s1272_s1 + $0x188] sm:$0xff]  ;;  %v66_v17 = vld [vmem:[%s1272_s1 + $0x198] sm:$0xff] }
   0x5   :  { %766 = vmatprep.subr.bf16.mxu0 %v765_v4  ;;  %v779_v14 = vpack.c.bf16 %v33_v12, %v17_v11  ;;  %778 = vmatprep.subr.bf16.mxu1 %v777_v9  ;;  %v769_v18 = vpack.c.bf16 %v64_v15, %v48_v13  ;;  %v781_v19 = vpack.c.bf16 %v66_v17, %v50_v16  ;;  %v47_v20 = vld [vmem:[%s1272_s1 + $0x100] sm:$0xff]  ;;  %v49_v22 = vld [vmem:[%s1272_s1 + $0x110] sm:$0xff]  ;;  %v80_v25 = vld [vmem:[%s1272_s1 + $0x208] sm:$0xff] }
   0x6   :  { %768 = vmatpush1.bf16.msra.mxu0 %v767_v10  ;;  %v63_v21 = vld [vmem:[%s1272_s1 + $0x180] sm:$0xff]  ;;  %v65_v24 = vld [vmem:[%s1272_s1 + $0x190] sm:$0xff]  ;;  %v96_v26 = vld [vmem:[%s1272_s1 + $0x288] sm:$0xff] }
   0x7   :  { %780 = vmatpush1.bf16.msra.mxu1 %v779_v14  ;;  %v771_v23 = vpack.c.bf16 %v63_v21, %v47_v20  ;;  %770 = vmatprep.subr.bf16.mxu0 %v769_v18  ;;  %v783_v27 = vpack.c.bf16 %v65_v24, %v49_v22  ;;  %v773_v28 = vpack.c.bf16 %v96_v26, %v80_v25  ;;  %v82_v29 = vld [vmem:[%s1272_s1 + $0x218] sm:$0xff]  ;;  %v79_v31 = vld [vmem:[%s1272_s1 + $0x200] sm:$0xff]  ;;  %v81_v34 = vld [vmem:[%s1272_s1 + $0x210] sm:$0xff] }
   0x8   :  { %782 = vmatprep.subr.bf16.mxu1 %v781_v19  ;;  %v98_v30 = vld [vmem:[%s1272_s1 + $0x298] sm:$0xff]  ;;  %v95_v33 = vld [vmem:[%s1272_s1 + $0x280] sm:$0xff]  ;;  %v97_v35 = vld [vmem:[%s1272_s1 + $0x290] sm:$0xff] }
   0x9   :  { %v785_v32 = vpack.c.bf16 %v98_v30, %v82_v29  ;;  %v775_v36 = vpack.c.bf16 %v95_v33, %v79_v31  ;;  %v20_v37 = vld [vmem:[%s1272_s1 + $0x28] sm:$0xff]  ;;  %v787_v39 = vpack.c.bf16 %v97_v35, %v81_v34  ;;  %v22_v41 = vld [vmem:[%s1272_s1 + $0x38] sm:$0xff]  ;;  %v19_v43 = vld [vmem:[%s1272_s1 + $0x20] sm:$0xff] }
   0xa   :  { %772 = vmatpush1.bf16.msra.mxu0 %v771_v23  ;;  %v36_v38 = vld [vmem:[%s1272_s1 + $0xa8] sm:$0xff]  ;;  %v38_v42 = vld [vmem:[%s1272_s1 + $0xb8] sm:$0xff]  ;;  %v35_v45 = vld [vmem:[%s1272_s1 + $0xa0] sm:$0xff] }
   0xb   :  { %784 = vmatpush1.bf16.msra.mxu1 %v783_v27  ;;  %774 = vmatprep.subr.bf16.mxu0 %v773_v28  ;;  %v789_v40 = vpack.c.bf16 %v36_v38, %v20_v37  ;;  %v801_v44 = vpack.c.bf16 %v38_v42, %v22_v41  ;;  %v21_v46 = vld [vmem:[%s1272_s1 + $0x30] sm:$0xff]  ;;  %v52_v48 = vld [vmem:[%s1272_s1 + $0x128] sm:$0xff]  ;;  %v54_v50 = vld [vmem:[%s1272_s1 + $0x138] sm:$0xff]  ;;  %v791_v52 = vpack.c.bf16 %v35_v45, %v19_v43 }
   0xc   :  { %786 = vmatprep.subr.bf16.mxu1 %v785_v32  ;;  %v37_v47 = vld [vmem:[%s1272_s1 + $0xb0] sm:$0xff]  ;;  %v68_v49 = vld [vmem:[%s1272_s1 + $0x1a8] sm:$0xff]  ;;  %v996_v51 = vld [vmem:[%s1273_s0] sm:$0xff] }
   0xd   :  { %v70_v53 = vld [vmem:[%s1272_s1 + $0x1b8] sm:$0xff]  ;;  %v803_v54 = vpack.c.bf16 %v37_v47, %v21_v46  ;;  %v793_v55 = vpack.c.bf16 %v68_v49, %v52_v48  ;;  %v51_v56 = vld [vmem:[%s1272_s1 + $0x120] sm:$0xff]  ;;  %v53_v58 = vld [vmem:[%s1272_s1 + $0x130] sm:$0xff] }
   0xe   :  { %776 = vmatpush1.bf16.msra.mxu0 %v775_v36  ;;  %v67_v57 = vld [vmem:[%s1272_s1 + $0x1a0] sm:$0xff]  ;;  %v805_v59 = vpack.c.bf16 %v70_v53, %v54_v50  ;;  %v69_v60 = vld [vmem:[%s1272_s1 + $0x1b0] sm:$0xff]  ;;  %v84_v61 = vld [vmem:[%s1272_s1 + $0x228] sm:$0xff] }
   0xf   :  { %788 = vmatpush1.bf16.msra.mxu1 %v787_v39  ;;  %790 = vmatprep.subr.bf16.mxu0 %v789_v40  ;;  %v100_v62 = vld [vmem:[%s1272_s1 + $0x2a8] sm:$0xff]  ;;  %v86_v63 = vld [vmem:[%s1272_s1 + $0x238] sm:$0xff]  ;;  %v795_v1 = vpack.c.bf16 %v67_v57, %v51_v56  ;;  %v807_v2 = vpack.c.bf16 %v69_v60, %v53_v58  ;;  %v83_v5 = vld [vmem:[%s1272_s1 + $0x220] sm:$0xff] }
  0x10   :  { %802 = vmatprep.subr.bf16.mxu1 %v801_v44  ;;  %v102_v0 = vld [vmem:[%s1272_s1 + $0x2b8] sm:$0xff]  ;;  %v797_v4 = vpack.c.bf16 %v100_v62, %v84_v61  ;;  %v99_v6 = vld [vmem:[%s1272_s1 + $0x2a0] sm:$0xff]  ;;  %v85_v7 = vld [vmem:[%s1272_s1 + $0x230] sm:$0xff] }
  0x11   :  { %757 = vmatmul.mubr.msk.f32.vlgmr.msra.gmra.mrb[0].mxu0 %vm117_vm0, %v996_v51  ;;  %v809_v8 = vpack.c.bf16 %v102_v0, %v86_v63  ;;  %v101_v9 = vld [vmem:[%s1272_s1 + $0x2b0] sm:$0xff]  ;;  %v24_v10 = vld [vmem:[%s1272_s1 + $0x48] sm:$0xff]  ;;  %v26_v12 = vld [vmem:[%s1272_s1 + $0x58] sm:$0xff]  ;;  %v799_v14 = vpack.c.bf16 %v99_v6, %v83_v5 }
  0x12   :  { %758 = vmatmul.mubr.msk.f32.vlgmr.msra.gmra.mrb[0].mxu1 %vm117_vm0, %v996_v51  ;;  %792 = vmatpush1.bf16.msra.mxu0 %v791_v52  ;;  %v40_v11 = vld [vmem:[%s1272_s1 + $0xc8] sm:$0xff]  ;;  %v42_v13 = vld [vmem:[%s1272_s1 + $0xd8] sm:$0xff]  ;;  %v811_v15 = vpack.c.bf16 %v101_v9, %v85_v7  ;;  %v23_v17 = vld [vmem:[%s1272_s1 + $0x40] sm:$0xff] }
  0x13   :  { %804 = vmatpush1.bf16.msra.mxu1 %v803_v54  ;;  %794 = vmatprep.subr.bf16.mxu0 %v793_v55  ;;  %v813_v16 = vpack.c.bf16 %v40_v11, %v24_v10  ;;  %v39_v18 = vld [vmem:[%s1272_s1 + $0xc0] sm:$0xff]  ;;  %v25_v19 = vld [vmem:[%s1272_s1 + $0x50] sm:$0xff]  ;;  %v825_v20 = vpack.c.bf16 %v42_v13, %v26_v12  ;;  %v56_v22 = vld [vmem:[%s1272_s1 + $0x148] sm:$0xff] }
  0x14   :  { %806 = vmatprep.subr.bf16.mxu1 %v805_v59  ;;  %327 = vmatprep.mubr.f32.mxu0 %v864_v3  ;;  %v41_v21 = vld [vmem:[%s1272_s1 + $0xd0] sm:$0xff]  ;;  %v72_v23 = vld [vmem:[%s1272_s1 + $0x1c8] sm:$0xff]  ;;  %v58_v24 = vld [vmem:[%s1272_s1 + $0x158] sm:$0xff]  ;;  %v815_v26 = vpack.c.bf16 %v39_v18, %v23_v17 }
  0x15   :  { %398 = vmatprep.mubr.f32.mxu1 %v864_v3  ;;  %v74_v25 = vld [vmem:[%s1272_s1 + $0x1d8] sm:$0xff]  ;;  %v827_v27 = vpack.c.bf16 %v41_v21, %v25_v19  ;;  %v817_v28 = vpack.c.bf16 %v72_v23, %v56_v22  ;;  %v55_v29 = vld [vmem:[%s1272_s1 + $0x140] sm:$0xff]  ;;  %v57_v31 = vld [vmem:[%s1272_s1 + $0x150] sm:$0xff] }
  0x16   :  { %796 = vmatpush1.bf16.msra.mxu0 %v795_v1  ;;  %v71_v30 = vld [vmem:[%s1272_s1 + $0x1c0] sm:$0xff]  ;;  %v829_v32 = vpack.c.bf16 %v74_v25, %v58_v24  ;;  %v73_v33 = vld [vmem:[%s1272_s1 + $0x1d0] sm:$0xff]  ;;  %v88_v34 = vld [vmem:[%s1272_s1 + $0x248] sm:$0xff] }
  0x17   :  { %808 = vmatpush1.bf16.msra.mxu1 %v807_v2  ;;  %798 = vmatprep.subr.bf16.mxu0 %v797_v4  ;;  %v104_v35 = vld [vmem:[%s1272_s1 + $0x2c8] sm:$0xff]  ;;  %v90_v36 = vld [vmem:[%s1272_s1 + $0x258] sm:$0xff]  ;;  %v819_v38 = vpack.c.bf16 %v71_v30, %v55_v29  ;;  %v831_v39 = vpack.c.bf16 %v73_v33, %v57_v31  ;;  %v87_v41 = vld [vmem:[%s1272_s1 + $0x240] sm:$0xff] }
  0x18   :  { %810 = vmatprep.subr.bf16.mxu1 %v809_v8  ;;  %v106_v37 = vld [vmem:[%s1272_s1 + $0x2d8] sm:$0xff]  ;;  %v821_v40 = vpack.c.bf16 %v104_v35, %v88_v34  ;;  %v103_v42 = vld [vmem:[%s1272_s1 + $0x2c0] sm:$0xff]  ;;  %v89_v43 = vld [vmem:[%s1272_s1 + $0x250] sm:$0xff] }
  0x19   :  { %v833_v44 = vpack.c.bf16 %v106_v37, %v90_v36  ;;  %v105_v45 = vld [vmem:[%s1272_s1 + $0x2d0] sm:$0xff]  ;;  %v28_v46 = vld [vmem:[%s1272_s1 + $0x68] sm:$0xff]  ;;  %v30_v48 = vld [vmem:[%s1272_s1 + $0x78] sm:$0xff]  ;;  %v823_v50 = vpack.c.bf16 %v103_v42, %v87_v41 }
  0x1a   :  { %800 = vmatpush1.bf16.msra.mxu0 %v799_v14  ;;  %v44_v47 = vld [vmem:[%s1272_s1 + $0xe8] sm:$0xff]  ;;  %v46_v49 = vld [vmem:[%s1272_s1 + $0xf8] sm:$0xff]  ;;  %v111_v52 = vld [vmem:[%s1274_s2] sm:$0xff]  ;;  %v835_v53 = vpack.c.bf16 %v105_v45, %v89_v43 }
  0x1b   :  { %812 = vmatpush1.bf16.msra.mxu1 %v811_v15  ;;  %814 = vmatprep.subr.bf16.mxu0 %v813_v16  ;;  %v837_v54 = vpack.c.bf16 %v44_v47, %v28_v46  ;;  %v27_v55 = vld [vmem:[%s1272_s1 + $0x60] sm:$0xff]  ;;  %v29_v57 = vld [vmem:[%s1272_s1 + $0x70] sm:$0xff]  ;;  %v849_v58 = vpack.c.bf16 %v46_v49, %v30_v48  ;;  %v60_v60 = vld [vmem:[%s1272_s1 + $0x168] sm:$0xff] }
  0x1c   :  { %826 = vmatprep.subr.bf16.mxu1 %v825_v20  ;;  %v43_v56 = vld [vmem:[%s1272_s1 + $0xe0] sm:$0xff]  ;;  %v45_v59 = vld [vmem:[%s1272_s1 + $0xf0] sm:$0xff]  ;;  %v76_v61 = vld [vmem:[%s1272_s1 + $0x1e8] sm:$0xff]  ;;  %114 = vperm.xlu0 %863, %v111_v52  }
  0x1d   :  { %759 = vmatmul.mubr.msk.f32.vlgmr.msra.gmra.mrb[2].mxu0 %vm117_vm0, %v996_v51  ;;  %v62_v62 = vld [vmem:[%s1272_s1 + $0x178] sm:$0xff]  ;;  %v839_v0 = vpack.c.bf16 %v43_v56, %v27_v55  ;;  %v851_v1 = vpack.c.bf16 %v45_v59, %v29_v57  ;;  %v841_v2 = vpack.c.bf16 %v76_v61, %v60_v60  ;;  %v59_v4 = vld [vmem:[%s1272_s1 + $0x160] sm:$0xff]  ;;  %v61_v6 = vld [vmem:[%s1272_s1 + $0x170] sm:$0xff] }
  0x1e   :  { %760 = vmatmul.mubr.msk.f32.vlgmr.msra.gmra.mrb[2].mxu1 %vm117_vm0, %v996_v51  ;;  %816 = vmatpush1.bf16.msra.mxu0 %v815_v26  ;;  %v78_v63 = vld [vmem:[%s1272_s1 + $0x1f8] sm:$0xff]  ;;  %v75_v5 = vld [vmem:[%s1272_s1 + $0x1e0] sm:$0xff]  ;;  %v77_v8 = vld [vmem:[%s1272_s1 + $0x1f0] sm:$0xff] }
  0x1f   :  { %828 = vmatpush1.bf16.msra.mxu1 %v827_v27  ;;  %818 = vmatprep.subr.bf16.mxu0 %v817_v28  ;;  %v853_v7 = vpack.c.bf16 %v78_v63, %v62_v62  ;;  %v92_v9 = vld [vmem:[%s1272_s1 + $0x268] sm:$0xff]  ;;  %v94_v11 = vld [vmem:[%s1272_s1 + $0x278] sm:$0xff]  ;;  %v843_v13 = vpack.c.bf16 %v75_v5, %v59_v4  ;;  %v855_v14 = vpack.c.bf16 %v77_v8, %v61_v6  ;;  %v91_v16 = vld [vmem:[%s1272_s1 + $0x260] sm:$0xff] }
  0x20   :  { %830 = vmatprep.subr.bf16.mxu1 %v829_v32  ;;  %469 = vmatprep.mubr.f32.mxu0 %v864_v3  ;;  %v108_v10 = vld [vmem:[%s1272_s1 + $0x2e8] sm:$0xff]  ;;  %v110_v12 = vld [vmem:[%s1272_s1 + $0x2f8] sm:$0xff]  ;;  %v107_v17 = vld [vmem:[%s1272_s1 + $0x2e0] sm:$0xff] }
  0x21   :  { %540 = vmatprep.mubr.f32.mxu1 %v864_v3  ;;  %v845_v15 = vpack.c.bf16 %v108_v10, %v92_v9  ;;  %v857_v18 = vpack.c.bf16 %v110_v12, %v94_v11  ;;  %v93_v19 = vld [vmem:[%s1272_s1 + $0x270] sm:$0xff]  ;;  %v847_v21 = vpack.c.bf16 %v107_v17, %v91_v16 }
  0x22   :  { %820 = vmatpush1.bf16.msra.mxu0 %v819_v38  ;;  %v109_v20 = vld [vmem:[%s1272_s1 + $0x2f0] sm:$0xff] }
  0x23   :  { %832 = vmatpush1.bf16.msra.mxu1 %v831_v39  ;;  %822 = vmatprep.subr.bf16.mxu0 %v821_v40  ;;  %v859_v22 = vpack.c.bf16 %v109_v20, %v93_v19 }
  0x24   :  { %834 = vmatprep.subr.bf16.mxu1 %v833_v44 }
  0x26   :  { %824 = vmatpush1.bf16.msra.mxu0 %v823_v50 }
  0x27   :  { %836 = vmatpush1.bf16.msra.mxu1 %v835_v53  ;;  %838 = vmatprep.subr.bf16.mxu0 %v837_v54 }
  0x28   :  { %850 = vmatprep.subr.bf16.mxu1 %v849_v58 }
  0x29   :  { %761 = vmatmul.mubr.msk.f32.vlgmr.msra.gmra.mrb[4].mxu0 %vm117_vm0, %v996_v51 }
  0x2a   :  { %762 = vmatmul.mubr.msk.f32.vlgmr.msra.gmra.mrb[4].mxu1 %vm117_vm0, %v996_v51  ;;  %840 = vmatpush1.bf16.msra.mxu0 %v839_v0 }
  0x2b   :  { %852 = vmatpush1.bf16.msra.mxu1 %v851_v1  ;;  %842 = vmatprep.subr.bf16.mxu0 %v841_v2 }
  0x2c   :  { %854 = vmatprep.subr.bf16.mxu1 %v853_v7  ;;  %611 = vmatprep.mubr.f32.mxu0 %v864_v3 }
  0x2d   :  { %682 = vmatprep.mubr.f32.mxu1 %v864_v3 }
  0x2e   :  { %844 = vmatpush1.bf16.msra.mxu0 %v843_v13 }
  0x2f   :  { %856 = vmatpush1.bf16.msra.mxu1 %v855_v14  ;;  %846 = vmatprep.subr.bf16.mxu0 %v845_v15 }
  0x30   :  { %858 = vmatprep.subr.bf16.mxu1 %v857_v18 }
  0x32   :  { %848 = vmatpush1.bf16.msra.mxu0 %v847_v21 }
  0x33   :  { %860 = vmatpush1.bf16.msra.mxu1 %v859_v22 }
  0x35   :  { %763 = vmatmul.mubr.msk.f32.vlgmr.msra.gmra.mrb[6].mxu0 %vm117_vm0, %v996_v51 }
  0x36   :  { %764 = vmatmul.mubr.msk.f32.vlgmr.msra.gmra.mrb[6].mxu1 %vm117_vm0, %v996_v51 }
  0x9b   :  { %v1206_v23 = vpop.permute.xlu0 %114 }
  0xe4   :  { %v187_v24 = vpop.f32.mrb[0].mxu0 }
  0xe5   :  { %v188_v25 = vadd.f32 %v187_v24, %v1206_v23  ;;  %v258_v3 = vpop.f32.mrb[0].mxu1  ;;  %v189_v26 = vpop.f32.mrb[1].mxu0 }
  0xe6   :  { %v259_v27 = vadd.f32 %v258_v3, %v1206_v23  ;;  %v190_v28 = vadd.f32 %v189_v26, %v1206_v23  ;;  %v260_v29 = vpop.f32.mrb[1].mxu1 }
  0xe7   :  { %vm689_vm1 = vcmp.gt.f32.partialorder %v188_v25, 0.0  ;;  %v705_v30 = vmul.f32 0.2, %v188_v25  ;;  %v261_v31 = vadd.f32 %v260_v29, %v1206_v23 }
  0xe8   :  { %vm691_vm2 = vcmp.gt.f32.partialorder %v259_v27, 0.0  ;;  %v707_v32 = vmul.f32 0.2, %v259_v27  ;;  %vm690_vm3 = vcmp.gt.f32.partialorder %v190_v28, 0.0  ;;  %v706_v51 = vmul.f32 0.2, %v190_v28 }
  0xe9   :  { %v721_v33 = vsel %vm689_vm1, %v188_v25, %v705_v30  ;;  %vm692_vm4 = vcmp.gt.f32.partialorder %v261_v31, 0.0  ;;  %v708_v34 = vmul.f32 0.2, %v261_v31 }
  0xea   :  { %737 = vst [vmem:[%s1275_s3] sm:$0xff] %v721_v33  ;;  %v723_v35 = vsel %vm691_vm2, %v259_v27, %v707_v32  ;;  %v722_v36 = vsel %vm690_vm3, %v190_v28, %v706_v51 }
  0xeb   :  { %739 = vst [vmem:[%s1275_s3 + $0x10] sm:$0xff] %v723_v35  ;;  %738 = vst [vmem:[%s1275_s3 + $0x8] sm:$0xff] %v722_v36  ;;  %v724_v37 = vsel %vm692_vm4, %v261_v31, %v708_v34 }
  0xec   :  { %740 = vst [vmem:[%s1275_s3 + $0x18] sm:$0xff] %v724_v37 }
  0xf0   :  { %v329_v38 = vpop.f32.mrb[2].mxu0 }
  0xf1   :  { %v330_v39 = vadd.f32 %v329_v38, %v1206_v23  ;;  %v400_v40 = vpop.f32.mrb[2].mxu1  ;;  %v331_v41 = vpop.f32.mrb[3].mxu0 }
  0xf2   :  { %v401_v42 = vadd.f32 %v400_v40, %v1206_v23  ;;  %v332_v43 = vadd.f32 %v331_v41, %v1206_v23  ;;  %v402_v44 = vpop.f32.mrb[3].mxu1 }
  0xf3   :  { %vm693_vm5 = vcmp.gt.f32.partialorder %v330_v39, 0.0  ;;  %v709_v45 = vmul.f32 0.2, %v330_v39  ;;  %v403_v46 = vadd.f32 %v402_v44, %v1206_v23 }
  0xf4   :  { %vm695_vm6 = vcmp.gt.f32.partialorder %v401_v42, 0.0  ;;  %v711_v47 = vmul.f32 0.2, %v401_v42  ;;  %vm694_vm7 = vcmp.gt.f32.partialorder %v332_v43, 0.0  ;;  %v710_v48 = vmul.f32 0.2, %v332_v43 }
  0xf5   :  { %v725_v49 = vsel %vm693_vm5, %v330_v39, %v709_v45  ;;  %vm696_vm8 = vcmp.gt.f32.partialorder %v403_v46, 0.0  ;;  %v712_v50 = vmul.f32 0.2, %v403_v46 }
  0xf6   :  { %741 = vst [vmem:[%s1275_s3 + $0x20] sm:$0xff] %v725_v49  ;;  %v727_v52 = vsel %vm695_vm6, %v401_v42, %v711_v47  ;;  %v726_v53 = vsel %vm694_vm7, %v332_v43, %v710_v48 }
  0xf7   :  { %743 = vst [vmem:[%s1275_s3 + $0x30] sm:$0xff] %v727_v52  ;;  %742 = vst [vmem:[%s1275_s3 + $0x28] sm:$0xff] %v726_v53  ;;  %v728_v54 = vsel %vm696_vm8, %v403_v46, %v712_v50 }
  0xf8   :  { %744 = vst [vmem:[%s1275_s3 + $0x38] sm:$0xff] %v728_v54 }
  0xfc   :  { %v471_v55 = vpop.f32.mrb[4].mxu0 }
  0xfd   :  { %v472_v56 = vadd.f32 %v471_v55, %v1206_v23  ;;  %v542_v57 = vpop.f32.mrb[4].mxu1  ;;  %v473_v58 = vpop.f32.mrb[5].mxu0 }
  0xfe   :  { %v543_v59 = vadd.f32 %v542_v57, %v1206_v23  ;;  %v474_v60 = vadd.f32 %v473_v58, %v1206_v23  ;;  %v544_v61 = vpop.f32.mrb[5].mxu1 }
  0xff   :  { %vm697_vm9 = vcmp.gt.f32.partialorder %v472_v56, 0.0  ;;  %v713_v62 = vmul.f32 0.2, %v472_v56  ;;  %v545_v63 = vadd.f32 %v544_v61, %v1206_v23 }
 0x100   :  { %vm699_vm10 = vcmp.gt.f32.partialorder %v543_v59, 0.0  ;;  %v715_v0 = vmul.f32 0.2, %v543_v59  ;;  %vm698_vm11 = vcmp.gt.f32.partialorder %v474_v60, 0.0  ;;  %v714_v1 = vmul.f32 0.2, %v474_v60 }
 0x101   :  { %v729_v2 = vsel %vm697_vm9, %v472_v56, %v713_v62  ;;  %vm700_vm12 = vcmp.gt.f32.partialorder %v545_v63, 0.0  ;;  %v716_v4 = vmul.f32 0.2, %v545_v63 }
 0x102   :  { %745 = vst [vmem:[%s1275_s3 + $0x40] sm:$0xff] %v729_v2  ;;  %v731_v5 = vsel %vm699_vm10, %v543_v59, %v715_v0  ;;  %v730_v6 = vsel %vm698_vm11, %v474_v60, %v714_v1 }
 0x103   :  { %747 = vst [vmem:[%s1275_s3 + $0x50] sm:$0xff] %v731_v5  ;;  %746 = vst [vmem:[%s1275_s3 + $0x48] sm:$0xff] %v730_v6  ;;  %v732_v7 = vsel %vm700_vm12, %v545_v63, %v716_v4 }
 0x104   :  { %748 = vst [vmem:[%s1275_s3 + $0x58] sm:$0xff] %v732_v7 }
 0x108   :  { %v613_v8 = vpop.f32.mrb[6].mxu0 }
 0x109   :  { %v614_v9 = vadd.f32 %v613_v8, %v1206_v23  ;;  %v684_v10 = vpop.f32.mrb[6].mxu1  ;;  %v615_v11 = vpop.f32.mrb[7].mxu0 }
 0x10a   :  { %v685_v12 = vadd.f32 %v684_v10, %v1206_v23  ;;  %v616_v13 = vadd.f32 %v615_v11, %v1206_v23  ;;  %v686_v14 = vpop.f32.mrb[7].mxu1 }
 0x10b   :  { %vm701_vm13 = vcmp.gt.f32.partialorder %v614_v9, 0.0  ;;  %v717_v15 = vmul.f32 0.2, %v614_v9  ;;  %v687_v16 = vadd.f32 %v686_v14, %v1206_v23 }
 0x10c   :  { %vm703_vm14 = vcmp.gt.f32.partialorder %v685_v12, 0.0  ;;  %v719_v17 = vmul.f32 0.2, %v685_v12  ;;  %vm702_vm15 = vcmp.gt.f32.partialorder %v616_v13, 0.0  ;;  %v718_v18 = vmul.f32 0.2, %v616_v13 }
 0x10d   :  { %v733_v19 = vsel %vm701_vm13, %v614_v9, %v717_v15  ;;  %vm704_vm0 = vcmp.gt.f32.partialorder %v687_v16, 0.0  ;;  %v720_v20 = vmul.f32 0.2, %v687_v16 }
 0x10e   :  { %749 = vst [vmem:[%s1275_s3 + $0x60] sm:$0xff] %v733_v19  ;;  %v735_v21 = vsel %vm703_vm14, %v685_v12, %v719_v17  ;;  %v734_v22 = vsel %vm702_vm15, %v616_v13, %v718_v18 }
 0x10f   :  { %751 = vst [vmem:[%s1275_s3 + $0x70] sm:$0xff] %v735_v21  ;;  %750 = vst [vmem:[%s1275_s3 + $0x68] sm:$0xff] %v734_v22  ;;  %v736_v23 = vsel %vm704_vm0, %v687_v16, %v720_v20 }
 0x110   :  { %752 = vst [vmem:[%s1275_s3 + $0x78] sm:$0xff] %v736_v23 }

// kernel: discriminator_forward.5
= control target key start
LH: loop header
LB: loop body
LE: loop exit
PB: predicated region body
PF: predicated region fallthrough
CT: control target
= control target key end

     0   :  { %v452_v3 = vmov 0.0   ;;  %v453_v8 = vmov 0   ;;  %s776_s1 = inlined_call_operand.vmem [shape: f32[128,512], index: 1, kind: input, shape index: {}]   ;;  %s777_s2 = inlined_call_operand.vmem [shape: f32[16,1], index: 2, kind: input, shape index: {}]   ;;  %s778_s0 = inlined_call_operand.vmem [shape: f32[16,128], index: 0, kind: input, shape index: {}]   ;;  %s779_s4 = inlined_call_operand.vmem [shape: f32[16,1], index: 4, kind: input, shape index: {}]   ;;  %s780_s3 = inlined_call_operand.vmem [shape: f32[16,1], index: 3, kind: input, shape index: {}]   ;;  %s781_s5 = inlined_call_operand.vmem [shape: f32[16,512], index: 5, kind: output, shape index: {}]  }
   0x1   :  { %v23_v0 = vld [vmem:[%s776_s1 + $0x8] sm:$0xff]  ;;  %v25_v2 = vld [vmem:[%s776_s1 + $0x18] sm:$0xff]  ;;  %162 = vmatprep.mubr.f32.mxu0 %v452_v3  ;;  %239 = vmatprep.mubr.f32.mxu1 %v452_v3  ;;  %v22_v6 = vld [vmem:[%s776_s1] sm:$0xff] }
   0x2   :  { %v27_v1 = vld [vmem:[%s776_s1 + $0x28] sm:$0xff]  ;;  %v29_v5 = vld [vmem:[%s776_s1 + $0x38] sm:$0xff]  ;;  %v26_v7 = vld [vmem:[%s776_s1 + $0x20] sm:$0xff]  ;;  %446 = vset.pattern.permute.xlu0 %v453_v8  ;;  %447 = vset.pattern.permute.xlu1 %v453_v8 }
   0x3   :  { %v380_v4 = vpack.c.bf16 %v27_v1, %v23_v0  ;;  %v412_v9 = vpack.c.bf16 %v29_v5, %v25_v2  ;;  %v382_v10 = vpack.c.bf16 %v26_v7, %v22_v6  ;;  %v24_v11 = vld [vmem:[%s776_s1 + $0x10] sm:$0xff]  ;;  %v31_v13 = vld [vmem:[%s776_s1 + $0x48] sm:$0xff]  ;;  %v33_v16 = vld [vmem:[%s776_s1 + $0x58] sm:$0xff] }
   0x4   :  { %v28_v12 = vld [vmem:[%s776_s1 + $0x30] sm:$0xff]  ;;  %v35_v15 = vld [vmem:[%s776_s1 + $0x68] sm:$0xff]  ;;  %v37_v17 = vld [vmem:[%s776_s1 + $0x78] sm:$0xff] }
   0x5   :  { %381 = vmatprep.subr.bf16.mxu0 %v380_v4  ;;  %v414_v14 = vpack.c.bf16 %v28_v12, %v24_v11  ;;  %413 = vmatprep.subr.bf16.mxu1 %v412_v9  ;;  %v384_v18 = vpack.c.bf16 %v35_v15, %v31_v13  ;;  %v416_v19 = vpack.c.bf16 %v37_v17, %v33_v16  ;;  %v30_v20 = vld [vmem:[%s776_s1 + $0x40] sm:$0xff]  ;;  %v32_v22 = vld [vmem:[%s776_s1 + $0x50] sm:$0xff]  ;;  %v39_v25 = vld [vmem:[%s776_s1 + $0x88] sm:$0xff] }
   0x6   :  { %383 = vmatpush1.bf16.msra.mxu0 %v382_v10  ;;  %v34_v21 = vld [vmem:[%s776_s1 + $0x60] sm:$0xff]  ;;  %v36_v24 = vld [vmem:[%s776_s1 + $0x70] sm:$0xff]  ;;  %v43_v26 = vld [vmem:[%s776_s1 + $0xa8] sm:$0xff] }
   0x7   :  { %415 = vmatpush1.bf16.msra.mxu1 %v414_v14  ;;  %v386_v23 = vpack.c.bf16 %v34_v21, %v30_v20  ;;  %385 = vmatprep.subr.bf16.mxu0 %v384_v18  ;;  %v418_v27 = vpack.c.bf16 %v36_v24, %v32_v22  ;;  %v388_v28 = vpack.c.bf16 %v43_v26, %v39_v25  ;;  %v41_v29 = vld [vmem:[%s776_s1 + $0x98] sm:$0xff]  ;;  %v38_v31 = vld [vmem:[%s776_s1 + $0x80] sm:$0xff]  ;;  %v40_v34 = vld [vmem:[%s776_s1 + $0x90] sm:$0xff] }
   0x8   :  { %417 = vmatprep.subr.bf16.mxu1 %v416_v19  ;;  %v45_v30 = vld [vmem:[%s776_s1 + $0xb8] sm:$0xff]  ;;  %v42_v33 = vld [vmem:[%s776_s1 + $0xa0] sm:$0xff]  ;;  %v44_v35 = vld [vmem:[%s776_s1 + $0xb0] sm:$0xff] }
   0x9   :  { %v420_v32 = vpack.c.bf16 %v45_v30, %v41_v29  ;;  %v390_v36 = vpack.c.bf16 %v42_v33, %v38_v31  ;;  %v47_v37 = vld [vmem:[%s776_s1 + $0xc8] sm:$0xff]  ;;  %v49_v39 = vld [vmem:[%s776_s1 + $0xd8] sm:$0xff]  ;;  %v422_v40 = vpack.c.bf16 %v44_v35, %v40_v34  ;;  %v46_v43 = vld [vmem:[%s776_s1 + $0xc0] sm:$0xff] }
   0xa   :  { %387 = vmatpush1.bf16.msra.mxu0 %v386_v23  ;;  %v51_v38 = vld [vmem:[%s776_s1 + $0xe8] sm:$0xff]  ;;  %v53_v42 = vld [vmem:[%s776_s1 + $0xf8] sm:$0xff]  ;;  %v50_v44 = vld [vmem:[%s776_s1 + $0xe0] sm:$0xff] }
   0xb   :  { %419 = vmatpush1.bf16.msra.mxu1 %v418_v27  ;;  %389 = vmatprep.subr.bf16.mxu0 %v388_v28  ;;  %v392_v41 = vpack.c.bf16 %v51_v38, %v47_v37  ;;  %v424_v45 = vpack.c.bf16 %v53_v42, %v49_v39  ;;  %v48_v46 = vld [vmem:[%s776_s1 + $0xd0] sm:$0xff]  ;;  %v55_v48 = vld [vmem:[%s776_s1 + $0x108] sm:$0xff]  ;;  %v57_v50 = vld [vmem:[%s776_s1 + $0x118] sm:$0xff]  ;;  %v394_v52 = vpack.c.bf16 %v50_v44, %v46_v43 }
   0xc   :  { %421 = vmatprep.subr.bf16.mxu1 %v420_v32  ;;  %v52_v47 = vld [vmem:[%s776_s1 + $0xf0] sm:$0xff]  ;;  %v59_v49 = vld [vmem:[%s776_s1 + $0x128] sm:$0xff]  ;;  %v61_v51 = vld [vmem:[%s776_s1 + $0x138] sm:$0xff] }
   0xd   :  { %v426_v53 = vpack.c.bf16 %v52_v47, %v48_v46  ;;  %v396_v54 = vpack.c.bf16 %v59_v49, %v55_v48  ;;  %v54_v55 = vld [vmem:[%s776_s1 + $0x100] sm:$0xff]  ;;  %v56_v57 = vld [vmem:[%s776_s1 + $0x110] sm:$0xff]  ;;  %v428_v58 = vpack.c.bf16 %v61_v51, %v57_v50  ;;  %v63_v60 = vld [vmem:[%s776_s1 + $0x148] sm:$0xff] }
   0xe   :  { %391 = vmatpush1.bf16.msra.mxu0 %v390_v36  ;;  %v58_v56 = vld [vmem:[%s776_s1 + $0x120] sm:$0xff]  ;;  %v60_v59 = vld [vmem:[%s776_s1 + $0x130] sm:$0xff]  ;;  %v67_v61 = vld [vmem:[%s776_s1 + $0x168] sm:$0xff] }
   0xf   :  { %423 = vmatpush1.bf16.msra.mxu1 %v422_v40  ;;  %393 = vmatprep.subr.bf16.mxu0 %v392_v41  ;;  %v65_v62 = vld [vmem:[%s776_s1 + $0x158] sm:$0xff]  ;;  %v398_v0 = vpack.c.bf16 %v58_v56, %v54_v55  ;;  %v430_v1 = vpack.c.bf16 %v60_v59, %v56_v57  ;;  %v400_v2 = vpack.c.bf16 %v67_v61, %v63_v60  ;;  %v62_v4 = vld [vmem:[%s776_s1 + $0x140] sm:$0xff]  ;;  %v64_v6 = vld [vmem:[%s776_s1 + $0x150] sm:$0xff] }
  0x10   :  { %425 = vmatprep.subr.bf16.mxu1 %v424_v45  ;;  %v69_v63 = vld [vmem:[%s776_s1 + $0x178] sm:$0xff]  ;;  %v66_v5 = vld [vmem:[%s776_s1 + $0x160] sm:$0xff]  ;;  %v68_v8 = vld [vmem:[%s776_s1 + $0x170] sm:$0xff] }
  0x11   :  { %v432_v7 = vpack.c.bf16 %v69_v63, %v65_v62  ;;  %v71_v9 = vld [vmem:[%s776_s1 + $0x188] sm:$0xff]  ;;  %v73_v11 = vld [vmem:[%s776_s1 + $0x198] sm:$0xff]  ;;  %v402_v13 = vpack.c.bf16 %v66_v5, %v62_v4  ;;  %v70_v14 = vld [vmem:[%s776_s1 + $0x180] sm:$0xff]  ;;  %v434_v15 = vpack.c.bf16 %v68_v8, %v64_v6 }
  0x12   :  { %395 = vmatpush1.bf16.msra.mxu0 %v394_v52  ;;  %v75_v10 = vld [vmem:[%s776_s1 + $0x1a8] sm:$0xff]  ;;  %v77_v12 = vld [vmem:[%s776_s1 + $0x1b8] sm:$0xff]  ;;  %v74_v17 = vld [vmem:[%s776_s1 + $0x1a0] sm:$0xff] }
  0x13   :  { %427 = vmatpush1.bf16.msra.mxu1 %v426_v53  ;;  %397 = vmatprep.subr.bf16.mxu0 %v396_v54  ;;  %v404_v16 = vpack.c.bf16 %v75_v10, %v71_v9  ;;  %v72_v18 = vld [vmem:[%s776_s1 + $0x190] sm:$0xff]  ;;  %v436_v20 = vpack.c.bf16 %v77_v12, %v73_v11  ;;  %v79_v21 = vld [vmem:[%s776_s1 + $0x1c8] sm:$0xff]  ;;  %v86_v23 = vld [vmem:[%s777_s2] sm:$0xff]  ;;  %v406_v26 = vpack.c.bf16 %v74_v17, %v70_v14 }
  0x14   :  { %429 = vmatprep.subr.bf16.mxu1 %v428_v58  ;;  %v76_v19 = vld [vmem:[%s776_s1 + $0x1b0] sm:$0xff]  ;;  %v83_v22 = vld [vmem:[%s776_s1 + $0x1e8] sm:$0xff]  ;;  %v81_v24 = vld [vmem:[%s776_s1 + $0x1d8] sm:$0xff]  ;;  %90 = vperm.xlu0 %446, %v86_v23  }
  0x15   :  { %v85_v25 = vld [vmem:[%s776_s1 + $0x1f8] sm:$0xff]  ;;  %v87_v27 = vld [vmem:[%s777_s2 + $0x8] sm:$0xff]  ;;  %v438_v28 = vpack.c.bf16 %v76_v19, %v72_v18  ;;  %v408_v29 = vpack.c.bf16 %v83_v22, %v79_v21  ;;  %v78_v30 = vld [vmem:[%s776_s1 + $0x1c0] sm:$0xff] }
  0x16   :  { %399 = vmatpush1.bf16.msra.mxu0 %v398_v0  ;;  %v82_v31 = vld [vmem:[%s776_s1 + $0x1e0] sm:$0xff]  ;;  %v440_v32 = vpack.c.bf16 %v85_v25, %v81_v24  ;;  %v80_v33 = vld [vmem:[%s776_s1 + $0x1d0] sm:$0xff]  ;;  %v21_v38 = vld [vmem:[%s778_s0 + $0x8] sm:$0xff] }
  0x17   :  { %431 = vmatpush1.bf16.msra.mxu1 %v430_v1  ;;  %401 = vmatprep.subr.bf16.mxu0 %v400_v2  ;;  %v84_v34 = vld [vmem:[%s776_s1 + $0x1f0] sm:$0xff]  ;;  %v410_v35 = vpack.c.bf16 %v82_v31, %v78_v30  ;;  %v20_v37 = vld [vmem:[%s778_s0] sm:$0xff] }
  0x18   :  { %433 = vmatprep.subr.bf16.mxu1 %v432_v7  ;;  %95 = vperm.xlu0 %446, %v87_v27   ;;  %v442_v36 = vpack.c.bf16 %v84_v34, %v80_v33  ;;  %v290_v30 = vld [vmem:[%s780_s3] sm:$0xff]  ;;  %v291_v33 = vld [vmem:[%s780_s3 + $0x8] sm:$0xff] }
  0x1a   :  { %403 = vmatpush1.bf16.msra.mxu0 %v402_v13  ;;  %v324_v13 = vld [vmem:[%s779_s4] sm:$0xff] }
  0x1b   :  { %435 = vmatpush1.bf16.msra.mxu1 %v434_v15  ;;  %405 = vmatprep.subr.bf16.mxu0 %v404_v16 }
  0x1c   :  { %437 = vmatprep.subr.bf16.mxu1 %v436_v20 }
  0x1e   :  { %407 = vmatpush1.bf16.msra.mxu0 %v406_v26 }
  0x1f   :  { %439 = vmatpush1.bf16.msra.mxu1 %v438_v28  ;;  %409 = vmatprep.subr.bf16.mxu0 %v408_v29 }
  0x20   :  { %441 = vmatprep.subr.bf16.mxu1 %v440_v32 }
  0x22   :  { %411 = vmatpush1.bf16.msra.mxu0 %v410_v35 }
  0x23   :  { %443 = vmatpush1.bf16.msra.mxu1 %v442_v36  ;;  %v325_v36 = vld [vmem:[%s779_s4 + $0x8] sm:$0xff] }
  0x25   :  { %163 = vmatmul.mubr.f32.vlgmr.msra.gmra.mrb[0].mxu0 %v20_v37 }
  0x26   :  { %240 = vmatmul.mubr.f32.vlgmr.msra.gmra.mrb[0].mxu1 %v20_v37  ;;  %168 = vmatprep.mubr.f32.mxu0 %v452_v3 }
  0x27   :  { %245 = vmatprep.mubr.f32.mxu1 %v452_v3 }
  0x29   :  { %169 = vmatmul.mubr.f32.gmra.mrb[2].mxu0 %v21_v38 }
  0x2a   :  { %246 = vmatmul.mubr.f32.gmra.mrb[2].mxu1 %v21_v38 }
  0x93   :  { %v91_v39 = vpop.permute.xlu0 %90 }
  0x97   :  { %v96_v48 = vpop.permute.xlu0 %95 }
  0xf8   :  { %v164_v40 = vpop.f32.mrb[0].mxu0 }
  0xf9   :  { %v692_v41 = vadd.f32 %v164_v40, %v91_v39  ;;  %v241_v42 = vpop.f32.mrb[0].mxu1  ;;  %v166_v43 = vpop.f32.mrb[1].mxu0 }
  0xfa   :  { %v694_v44 = vadd.f32 %v166_v43, %v91_v39  ;;  %v243_v45 = vpop.f32.mrb[1].mxu1  ;;  %v698_v47 = vadd.f32 %v241_v42, %v91_v39 }
  0xfb   :  { %v264_v46 = vmul.f32 %v692_v41, %v692_v41  ;;  %v704_v51 = vadd.f32 %v243_v45, %v91_v39 }
  0xfc   :  { %v265_v3 = vmul.f32 %v694_v44, %v694_v44  ;;  %v170_v49 = vpop.f32.mrb[2].mxu0  ;;  %v252_v50 = vadd.f32 %v694_v44, %v692_v41  ;;  %v266_v60 = vmul.f32 %v698_v47, %v698_v47 }
  0xfd   :  { %v706_v52 = vadd.f32 %v170_v49, %v96_v48  ;;  %v247_v53 = vpop.f32.mrb[2].mxu1  ;;  %v172_v54 = vpop.f32.mrb[3].mxu0  ;;  %v267_v1 = vmul.f32 %v704_v51, %v704_v51 }
  0xfe   :  { %v708_v55 = vadd.f32 %v247_v53, %v96_v48  ;;  %v710_v56 = vadd.f32 %v172_v54, %v96_v48  ;;  %v249_v57 = vpop.f32.mrb[3].mxu1  ;;  %v253_v58 = vadd.f32 %v252_v50, %v698_v47  ;;  %v272_v59 = vadd.f32 %v265_v3, %v264_v46 }
  0xff   :  { %v268_v61 = vmul.f32 %v706_v52, %v706_v52  ;;  %v726_v5 = vadd.f32 %v249_v57, %v96_v48 }
 0x100   :  { %v257_v62 = vadd.f32 %v710_v56, %v706_v52  ;;  %v269_v63 = vmul.f32 %v710_v56, %v710_v56  ;;  %v254_v0 = vadd.f32 %v253_v58, %v704_v51  ;;  %v273_v2 = vadd.f32 %v272_v59, %v266_v60 }
 0x101   :  { %v270_v4 = vmul.f32 %v708_v55, %v708_v55  ;;  %v271_v11 = vmul.f32 %v726_v5, %v726_v5 }
 0x102   :  { %255 = vadd.xlane.f32.xlu1 %v254_v0  ;;  %v258_v6 = vadd.f32 %v257_v62, %v708_v55  ;;  %v277_v7 = vadd.f32 %v269_v63, %v268_v61  ;;  %v274_v8 = vadd.f32 %v273_v2, %v267_v1 }
 0x104   :  { %v259_v9 = vadd.f32 %v258_v6, %v726_v5  ;;  %v278_v10 = vadd.f32 %v277_v7, %v270_v4  ;;  %275 = vadd.xlane.f32.xlu0 %v274_v8 }
 0x106   :  { %260 = vadd.xlane.f32.xlu1 %v259_v9  ;;  %v279_v12 = vadd.f32 %v278_v10, %v271_v11 }
 0x10a   :  { %280 = vadd.xlane.f32.xlu1 %v279_v12 }
 0x11b   :  { %328 = vperm.xlu1 %447, %v324_v13  }
 0x18f   :  { %v256_v14 = vpop.xlane.xlu1 %255 }
 0x190   :  { %v262_v15 = vmul.f32 0.001953125, %v256_v14 }
 0x191   :  { %v276_v16 = vpop.xlane.xlu0 %275 }
 0x192   :  { %v284_v17 = vmul.f32 %v262_v15, %v262_v15  ;;  %v282_v18 = vmul.f32 0.001953125, %v276_v16  ;;  %v298_v38 = vsub.f32 %v692_v41, %v262_v15  ;;  %v299_v39 = vsub.f32 %v694_v44, %v262_v15 }
 0x193   :  { %v261_v19 = vpop.xlane.xlu1 %260  ;;  %v300_v40 = vsub.f32 %v698_v47, %v262_v15  ;;  %v301_v42 = vsub.f32 %v704_v51, %v262_v15 }
 0x194   :  { %v263_v20 = vmul.f32 0.001953125, %v261_v19  ;;  %v286_v21 = vsub.f32 %v282_v18, %v284_v17 }
 0x196   :  { %v288_v22 = vmax.f32 %v286_v21, 0.0  ;;  %v285_v24 = vmul.f32 %v263_v20, %v263_v20  ;;  %v302_v57 = vsub.f32 %v706_v52, %v263_v20  ;;  %v303_v58 = vsub.f32 %v710_v56, %v263_v20 }
 0x197   :  { %v281_v23 = vpop.xlane.xlu1 %280  ;;  %v304_v41 = vsub.f32 %v708_v55, %v263_v20  ;;  %v305_v60 = vsub.f32 %v726_v5, %v263_v20 }
 0x198   :  { %v283_v25 = vmul.f32 0.001953125, %v281_v23  ;;  %v292_v26 = vadd.f32 1e-05, %v288_v22 }
 0x19a   :  { %v287_v27 = vsub.f32 %v283_v25, %v285_v24  ;;  %448 = vrsqrt.f32 %v292_v26 }
 0x19b   :  { %v329_v37 = vpop.permute.xlu1 %328 }
 0x19c   :  { %v289_v28 = vmax.f32 %v287_v27, 0.0 }
 0x19e   :  { %v293_v29 = vadd.f32 1e-05, %v289_v28 }
 0x1a0   :  { %450 = vrsqrt.f32 %v293_v29 }
 0x1a4   :  { %v449_v31 = vpop.eup %448 }
 0x1a5   :  { %v296_v32 = vmul.f32 %v449_v31, %v290_v30 }
 0x1a7   :  { %308 = vperm.xlu1 %447, %v296_v32  }
 0x1aa   :  { %v451_v34 = vpop.eup %450 }
 0x1ab   :  { %v297_v35 = vmul.f32 %v451_v34, %v291_v33 }
 0x1ad   :  { %313 = vperm.xlu1 %447, %v297_v35  }
 0x1b1   :  { %333 = vperm.xlu1 %447, %v325_v36  }
 0x226   :  { %v309_v43 = vpop.permute.xlu1 %308 }
 0x227   :  { %v316_v45 = vmul.f32 %v309_v43, %v298_v38  ;;  %v317_v46 = vmul.f32 %v309_v43, %v299_v39  ;;  %v318_v48 = vmul.f32 %v309_v43, %v300_v40  ;;  %v319_v3 = vmul.f32 %v309_v43, %v301_v42 }
 0x229   :  { %v336_v49 = vadd.f32 %v329_v37, %v316_v45  ;;  %v337_v50 = vadd.f32 %v329_v37, %v317_v46  ;;  %v338_v53 = vadd.f32 %v329_v37, %v318_v48  ;;  %v339_v54 = vadd.f32 %v329_v37, %v319_v3 }
 0x22b   :  { %vm344_vm0 = vcmp.gt.f32.partialorder %v336_v49, 0.0  ;;  %vm345_vm1 = vcmp.gt.f32.partialorder %v337_v50, 0.0  ;;  %vm346_vm2 = vcmp.gt.f32.partialorder %v338_v53, 0.0  ;;  %vm347_vm3 = vcmp.gt.f32.partialorder %v339_v54, 0.0 }
 0x22c   :  { %v314_v44 = vpop.permute.xlu1 %313  ;;  %v352_v47 = vmul.f32 0.2, %v336_v49  ;;  %v353_v51 = vmul.f32 0.2, %v337_v50  ;;  %v354_v59 = vmul.f32 0.2, %v338_v53 }
 0x22d   :  { %v355_v61 = vmul.f32 0.2, %v339_v54  ;;  %v320_v62 = vmul.f32 %v314_v44, %v302_v57  ;;  %v321_v63 = vmul.f32 %v314_v44, %v303_v58  ;;  %v322_v0 = vmul.f32 %v314_v44, %v304_v41 }
 0x22e   :  { %v360_v1 = vsel %vm344_vm0, %v336_v49, %v352_v47  ;;  %v361_v52 = vsel %vm345_vm1, %v337_v50, %v353_v51  ;;  %v362_v2 = vsel %vm346_vm2, %v338_v53, %v354_v59  ;;  %v323_v56 = vmul.f32 %v314_v44, %v305_v60 }
 0x22f   :  { %v363_v4 = vsel %vm347_vm3, %v339_v54, %v355_v61  ;;  %368 = vst [vmem:[%s781_s5] sm:$0xff] %v360_v1  ;;  %369 = vst [vmem:[%s781_s5 + $0x8] sm:$0xff] %v361_v52 }
 0x230   :  { %370 = vst [vmem:[%s781_s5 + $0x10] sm:$0xff] %v362_v2  ;;  %v334_v55 = vpop.permute.xlu1 %333  ;;  %371 = vst [vmem:[%s781_s5 + $0x18] sm:$0xff] %v363_v4 }
 0x231   :  { %v340_v5 = vadd.f32 %v334_v55, %v320_v62  ;;  %v341_v6 = vadd.f32 %v334_v55, %v321_v63  ;;  %v342_v7 = vadd.f32 %v334_v55, %v322_v0  ;;  %v343_v8 = vadd.f32 %v334_v55, %v323_v56 }
 0x233   :  { %vm348_vm4 = vcmp.gt.f32.partialorder %v340_v5, 0.0  ;;  %vm349_vm5 = vcmp.gt.f32.partialorder %v341_v6, 0.0  ;;  %vm350_vm6 = vcmp.gt.f32.partialorder %v342_v7, 0.0  ;;  %vm351_vm7 = vcmp.gt.f32.partialorder %v343_v8, 0.0 }
 0x234   :  { %v356_v9 = vmul.f32 0.2, %v340_v5  ;;  %v357_v10 = vmul.f32 0.2, %v341_v6  ;;  %v358_v11 = vmul.f32 0.2, %v342_v7 }
 0x235   :  { %v359_v12 = vmul.f32 0.2, %v343_v8 }
 0x236   :  { %v364_v13 = vsel %vm348_vm4, %v340_v5, %v356_v9  ;;  %v365_v14 = vsel %vm349_vm5, %v341_v6, %v357_v10  ;;  %v366_v15 = vsel %vm350_vm6, %v342_v7, %v358_v11 }
 0x237   :  { %v367_v16 = vsel %vm351_vm7, %v343_v8, %v359_v12  ;;  %372 = vst [vmem:[%s781_s5 + $0x20] sm:$0xff] %v364_v13  ;;  %373 = vst [vmem:[%s781_s5 + $0x28] sm:$0xff] %v365_v14 }
 0x238   :  { %374 = vst [vmem:[%s781_s5 + $0x30] sm:$0xff] %v366_v15  ;;  %375 = vst [vmem:[%s781_s5 + $0x38] sm:$0xff] %v367_v16 }

// kernel: discriminator_forward.6
= control target key start
LH: loop header
LB: loop body
LE: loop exit
PB: predicated region body
PF: predicated region fallthrough
CT: control target
= control target key end

     0   :  { %v404_v3 = vmov 0   ;;  %s637_s1 = inlined_call_operand.vmem [shape: f32[256,128], index: 1, kind: input, shape index: {}]   ;;  %s638_s0 = inlined_call_operand.vmem [shape: f32[32,256], index: 0, kind: input, shape index: {}]   ;;  %s639_s2 = inlined_call_operand.vmem [shape: f32[32,1], index: 2, kind: input, shape index: {}]   ;;  %s640_s4 = inlined_call_operand.vmem [shape: f32[32,1], index: 4, kind: input, shape index: {}]   ;;  %s641_s3 = inlined_call_operand.vmem [shape: f32[32,1], index: 3, kind: input, shape index: {}]   ;;  %s642_s5 = inlined_call_operand.vmem [shape: f32[32,128], index: 5, kind: output, shape index: {}]  }
   0x1   :  { %v44_v0 = vld [vmem:[%s637_s1 + $0x80] sm:$0xff]  ;;  %v45_v1 = vld [vmem:[%s637_s1 + $0x88] sm:$0xff]  ;;  %394 = vset.pattern.permute.xlu0 %v404_v3  ;;  %395 = vset.pattern.permute.xlu1 %v404_v3  ;;  %v46_v6 = vld [vmem:[%s637_s1 + $0x90] sm:$0xff] }
   0x2   :  { %v28_v2 = vld [vmem:[%s637_s1] sm:$0xff]  ;;  %v345_v4 = vpack.c.bf16 %v45_v1, %v44_v0  ;;  %v29_v5 = vld [vmem:[%s637_s1 + $0x8] sm:$0xff]  ;;  %v47_v7 = vld [vmem:[%s637_s1 + $0x98] sm:$0xff] }
   0x3   :  { %v347_v8 = vpack.c.bf16 %v29_v5, %v28_v2  ;;  %v349_v9 = vpack.c.bf16 %v47_v7, %v46_v6  ;;  %v30_v10 = vld [vmem:[%s637_s1 + $0x10] sm:$0xff]  ;;  %v31_v11 = vld [vmem:[%s637_s1 + $0x18] sm:$0xff]  ;;  %v48_v12 = vld [vmem:[%s637_s1 + $0xa0] sm:$0xff] }
   0x4   :  { %346 = vmatprep.subr.bf16.mxu0 %v345_v4  ;;  %377 = vmatprep.subr.bf16.mxu1 %v345_v4  ;;  %v49_v13 = vld [vmem:[%s637_s1 + $0xa8] sm:$0xff]  ;;  %v351_v14 = vpack.c.bf16 %v31_v11, %v30_v10  ;;  %v32_v16 = vld [vmem:[%s637_s1 + $0x20] sm:$0xff]  ;;  %v50_v18 = vld [vmem:[%s637_s1 + $0xb0] sm:$0xff] }
   0x5   :  { %348 = vmatpush3.bf16.msra.mxu0 %v347_v8  ;;  %385 = vmatpush3.bf16.msra.mxu1 %v347_v8  ;;  %v353_v15 = vpack.c.bf16 %v49_v13, %v48_v12  ;;  %v33_v17 = vld [vmem:[%s637_s1 + $0x28] sm:$0xff]  ;;  %v51_v19 = vld [vmem:[%s637_s1 + $0xb8] sm:$0xff]  ;;  %v34_v22 = vld [vmem:[%s637_s1 + $0x30] sm:$0xff] }
   0x6   :  { %350 = vmatprep.subr.bf16.mxu0 %v349_v9  ;;  %378 = vmatprep.subr.bf16.mxu1 %v349_v9  ;;  %v355_v20 = vpack.c.bf16 %v33_v17, %v32_v16  ;;  %v357_v21 = vpack.c.bf16 %v51_v19, %v50_v18  ;;  %v35_v23 = vld [vmem:[%s637_s1 + $0x38] sm:$0xff]  ;;  %v52_v24 = vld [vmem:[%s637_s1 + $0xc0] sm:$0xff]  ;;  %v53_v25 = vld [vmem:[%s637_s1 + $0xc8] sm:$0xff] }
   0x7   :  { %v21_v26 = vld [vmem:[%s638_s0 + $0x8] sm:$0xff]  ;;  %v359_v28 = vpack.c.bf16 %v35_v23, %v34_v22  ;;  %v36_v29 = vld [vmem:[%s637_s1 + $0x40] sm:$0xff]  ;;  %v361_v30 = vpack.c.bf16 %v53_v25, %v52_v24  ;;  %v62_v33 = vld [vmem:[%s639_s2 + $0x10] sm:$0xff] }
   0x8   :  { %148 = vmatprep.mubr.f32.mxu0 %v21_v26  ;;  %v25_v27 = vld [vmem:[%s638_s0 + $0x28] sm:$0xff]  ;;  %v60_v32 = vld [vmem:[%s639_s2] sm:$0xff]  ;;  %v54_v34 = vld [vmem:[%s637_s1 + $0xd0] sm:$0xff]  ;;  %76 = vperm.xlu1 %395, %v62_v33  }
   0x9   :  { %352 = vmatpush3.bf16.msra.mxu0 %v351_v14  ;;  %386 = vmatpush3.bf16.msra.mxu1 %v351_v14  ;;  %v37_v31 = vld [vmem:[%s637_s1 + $0x48] sm:$0xff]  ;;  %v55_v35 = vld [vmem:[%s637_s1 + $0xd8] sm:$0xff]  ;;  %v38_v40 = vld [vmem:[%s637_s1 + $0x50] sm:$0xff] }
   0xa   :  { %354 = vmatprep.subr.bf16.mxu0 %v353_v15  ;;  %379 = vmatprep.subr.bf16.mxu1 %v353_v15  ;;  %v61_v36 = vld [vmem:[%s639_s2 + $0x8] sm:$0xff]  ;;  %v363_v37 = vpack.c.bf16 %v37_v31, %v36_v29  ;;  %v63_v38 = vld [vmem:[%s639_s2 + $0x18] sm:$0xff]  ;;  %v365_v39 = vpack.c.bf16 %v55_v35, %v54_v34  ;;  %v56_v42 = vld [vmem:[%s637_s1 + $0xe0] sm:$0xff] }
   0xb   :  { %158 = vmatprep.mubr.f32.mxu1 %v25_v27  ;;  %66 = vperm.xlu0 %394, %v60_v32   ;;  %v39_v41 = vld [vmem:[%s637_s1 + $0x58] sm:$0xff]  ;;  %v57_v43 = vld [vmem:[%s637_s1 + $0xe8] sm:$0xff]  ;;  %v40_v46 = vld [vmem:[%s637_s1 + $0x60] sm:$0xff] }
   0xc   :  { %81 = vperm.xlu1 %395, %v63_v38   ;;  %v367_v44 = vpack.c.bf16 %v39_v41, %v38_v40  ;;  %v369_v45 = vpack.c.bf16 %v57_v43, %v56_v42  ;;  %v41_v47 = vld [vmem:[%s637_s1 + $0x68] sm:$0xff]  ;;  %v58_v48 = vld [vmem:[%s637_s1 + $0xf0] sm:$0xff]  ;;  %v59_v49 = vld [vmem:[%s637_s1 + $0xf8] sm:$0xff] }
   0xd   :  { %356 = vmatpush3.bf16.msra.mxu0 %v355_v20  ;;  %387 = vmatpush3.bf16.msra.mxu1 %v355_v20  ;;  %v371_v50 = vpack.c.bf16 %v41_v47, %v40_v46  ;;  %v373_v51 = vpack.c.bf16 %v59_v49, %v58_v48  ;;  %v42_v52 = vld [vmem:[%s637_s1 + $0x70] sm:$0xff]  ;;  %v43_v53 = vld [vmem:[%s637_s1 + $0x78] sm:$0xff]  ;;  %v20_v55 = vld [vmem:[%s638_s0] sm:$0xff] }
   0xe   :  { %358 = vmatprep.subr.bf16.mxu0 %v357_v21  ;;  %380 = vmatprep.subr.bf16.mxu1 %v357_v21  ;;  %v375_v54 = vpack.c.bf16 %v43_v53, %v42_v52  ;;  %v24_v56 = vld [vmem:[%s638_s0 + $0x20] sm:$0xff]  ;;  %v23_v57 = vld [vmem:[%s638_s0 + $0x18] sm:$0xff]  ;;  %v22_v59 = vld [vmem:[%s638_s0 + $0x10] sm:$0xff] }
   0xf   :  { %71 = vperm.xlu0 %394, %v61_v36   ;;  %v27_v58 = vld [vmem:[%s638_s0 + $0x38] sm:$0xff]  ;;  %v26_v60 = vld [vmem:[%s638_s0 + $0x30] sm:$0xff]  ;;  %v254_v21 = vld [vmem:[%s640_s4 + $0x8] sm:$0xff] }
  0x10   :  { %v253_v22 = vld [vmem:[%s640_s4] sm:$0xff] }
  0x11   :  { %360 = vmatpush3.bf16.msra.mxu0 %v359_v28  ;;  %388 = vmatpush3.bf16.msra.mxu1 %v359_v28  ;;  %v209_v53 = vld [vmem:[%s641_s3] sm:$0xff] }
  0x12   :  { %362 = vmatprep.subr.bf16.mxu0 %v361_v30  ;;  %381 = vmatprep.subr.bf16.mxu1 %v361_v30 }
  0x15   :  { %364 = vmatpush3.bf16.msra.mxu0 %v363_v37  ;;  %389 = vmatpush3.bf16.msra.mxu1 %v363_v37 }
  0x16   :  { %366 = vmatprep.subr.bf16.mxu0 %v365_v39  ;;  %382 = vmatprep.subr.bf16.mxu1 %v365_v39 }
  0x19   :  { %368 = vmatpush3.bf16.msra.mxu0 %v367_v44  ;;  %390 = vmatpush3.bf16.msra.mxu1 %v367_v44 }
  0x1a   :  { %370 = vmatprep.subr.bf16.mxu0 %v369_v45  ;;  %383 = vmatprep.subr.bf16.mxu1 %v369_v45 }
  0x1d   :  { %372 = vmatpush3.bf16.msra.mxu0 %v371_v50  ;;  %391 = vmatpush3.bf16.msra.mxu1 %v371_v50 }
  0x1e   :  { %374 = vmatprep.subr.bf16.mxu0 %v373_v51  ;;  %384 = vmatprep.subr.bf16.mxu1 %v373_v51 }
  0x21   :  { %376 = vmatpush3.bf16.msra.mxu0 %v375_v54  ;;  %392 = vmatpush3.bf16.msra.mxu1 %v375_v54 }
  0x24   :  { %149 = vmatmul.mubr.f32.vlgmr.msra.gmra.mrb[0].mxu0 %v20_v55  ;;  %159 = vmatmul.mubr.f32.vlgmr.msra.gmra.mrb[0].mxu1 %v24_v56 }
  0x25   :  { %153 = vmatprep.mubr.f32.mxu0 %v23_v57  ;;  %163 = vmatprep.mubr.f32.mxu1 %v27_v58  ;;  %v211_v58 = vld [vmem:[%s641_s3 + $0x10] sm:$0xff] }
  0x28   :  { %154 = vmatmul.mubr.f32.gmra.mrb[2].mxu0 %v22_v59  ;;  %164 = vmatmul.mubr.f32.gmra.mrb[2].mxu1 %v26_v60  ;;  %v210_v60 = vld [vmem:[%s641_s3 + $0x8] sm:$0xff] }
  0x87   :  { %v77_v4 = vpop.permute.xlu1 %76 }
  0x8a   :  { %v67_v3 = vpop.permute.xlu0 %66 }
  0x8b   :  { %v82_v15 = vpop.permute.xlu1 %81 }
  0x8e   :  { %v72_v14 = vpop.permute.xlu0 %71 }
  0xf7   :  { %v333_v61 = vpop.f32.mrb[0].mxu0  ;;  %v339_v62 = vpop.f32.mrb[0].mxu1 }
  0xf8   :  { %v334_v63 = vpop.f32.mrb[1].mxu0  ;;  %v340_v0 = vpop.f32.mrb[1].mxu1 }
  0xf9   :  { %v335_v1 = vadd.f32 %v334_v63, %v333_v61  ;;  %v341_v2 = vadd.f32 %v340_v0, %v339_v62  ;;  %v212_v0 = vld [vmem:[%s641_s3 + $0x18] sm:$0xff] }
  0xfb   :  { %v567_v5 = vadd.f32 %v335_v1, %v67_v3  ;;  %v336_v6 = vpop.f32.mrb[2].mxu0  ;;  %v342_v7 = vpop.f32.mrb[2].mxu1  ;;  %v569_v10 = vadd.f32 %v341_v2, %v77_v4  ;;  %v255_v2 = vld [vmem:[%s640_s4 + $0x10] sm:$0xff]  ;;  %v256_v4 = vld [vmem:[%s640_s4 + $0x18] sm:$0xff] }
  0xfc   :  { %v337_v8 = vpop.f32.mrb[3].mxu0  ;;  %v343_v9 = vpop.f32.mrb[3].mxu1 }
  0xfd   :  { %v338_v11 = vadd.f32 %v337_v8, %v336_v6  ;;  %v344_v12 = vadd.f32 %v343_v9, %v342_v7  ;;  %169 = vadd.xlane.f32.xlu0 %v567_v5  ;;  %v181_v13 = vmul.f32 %v567_v5, %v567_v5  ;;  %v183_v18 = vmul.f32 %v569_v10, %v569_v10 }
  0xff   :  { %185 = vadd.xlane.f32.xlu1 %v181_v13  ;;  %v574_v16 = vadd.f32 %v338_v11, %v72_v14  ;;  %v577_v17 = vadd.f32 %v344_v12, %v82_v15 }
 0x101   :  { %173 = vadd.xlane.f32.xlu0 %v569_v10  ;;  %v182_v19 = vmul.f32 %v574_v16, %v574_v16  ;;  %v184_v20 = vmul.f32 %v577_v17, %v577_v17 }
 0x103   :  { %171 = vadd.xlane.f32.xlu1 %v574_v16 }
 0x105   :  { %175 = vadd.xlane.f32.xlu0 %v577_v17 }
 0x107   :  { %189 = vadd.xlane.f32.xlu1 %v183_v18 }
 0x109   :  { %187 = vadd.xlane.f32.xlu0 %v182_v19 }
 0x10d   :  { %191 = vadd.xlane.f32.xlu0 %v184_v20 }
 0x118   :  { %264 = vperm.xlu1 %395, %v254_v21  }
 0x123   :  { %259 = vperm.xlu0 %394, %v253_v22  }
 0x18a   :  { %v170_v23 = vpop.xlane.xlu0 %169 }
 0x18b   :  { %v177_v24 = vmul.f32 0.0078125, %v170_v23 }
 0x18c   :  { %v186_v25 = vpop.xlane.xlu1 %185 }
 0x18d   :  { %v197_v26 = vmul.f32 %v177_v24, %v177_v24  ;;  %v193_v27 = vmul.f32 0.0078125, %v186_v25  ;;  %v225_v7 = vsub.f32 %v567_v5, %v177_v24 }
 0x18e   :  { %v174_v28 = vpop.xlane.xlu0 %173 }
 0x18f   :  { %v201_v29 = vsub.f32 %v193_v27, %v197_v26  ;;  %v593_v32 = vmul.f32 0.0078125, %v174_v28 }
 0x190   :  { %v172_v30 = vpop.xlane.xlu1 %171 }
 0x191   :  { %v205_v31 = vmax.f32 %v201_v29, 0.0  ;;  %v178_v35 = vmul.f32 0.0078125, %v172_v30  ;;  %v199_v37 = vmul.f32 %v593_v32, %v593_v32  ;;  %v227_v20 = vsub.f32 %v569_v10, %v593_v32 }
 0x192   :  { %v176_v33 = vpop.xlane.xlu0 %175 }
 0x193   :  { %v213_v34 = vadd.f32 1e-05, %v205_v31  ;;  %v198_v40 = vmul.f32 %v178_v35, %v178_v35  ;;  %v597_v41 = vmul.f32 0.0078125, %v176_v33  ;;  %v226_v15 = vsub.f32 %v574_v16, %v178_v35 }
 0x194   :  { %v190_v36 = vpop.xlane.xlu1 %189 }
 0x195   :  { %396 = vrsqrt.f32 %v213_v34  ;;  %v195_v38 = vmul.f32 0.0078125, %v190_v36  ;;  %v200_v47 = vmul.f32 %v597_v41, %v597_v41  ;;  %v228_v27 = vsub.f32 %v577_v17, %v597_v41 }
 0x196   :  { %v188_v39 = vpop.xlane.xlu0 %187 }
 0x197   :  { %v203_v42 = vsub.f32 %v195_v38, %v199_v37  ;;  %v194_v43 = vmul.f32 0.0078125, %v188_v39 }
 0x198   :  { %v265_v6 = vpop.permute.xlu1 %264 }
 0x199   :  { %v207_v44 = vmax.f32 %v203_v42, 0.0  ;;  %v202_v45 = vsub.f32 %v194_v43, %v198_v40 }
 0x19a   :  { %v192_v46 = vpop.xlane.xlu0 %191 }
 0x19b   :  { %v215_v48 = vadd.f32 1e-05, %v207_v44  ;;  %v206_v49 = vmax.f32 %v202_v45, 0.0  ;;  %v196_v50 = vmul.f32 0.0078125, %v192_v46 }
 0x19d   :  { %398 = vrsqrt.f32 %v215_v48  ;;  %v214_v51 = vadd.f32 1e-05, %v206_v49  ;;  %v204_v52 = vsub.f32 %v196_v50, %v200_v47 }
 0x19f   :  { %v397_v54 = vpop.eup %396  ;;  %400 = vrsqrt.f32 %v214_v51  ;;  %v208_v55 = vmax.f32 %v204_v52, 0.0 }
 0x1a0   :  { %v221_v56 = vmul.f32 %v397_v54, %v209_v53 }
 0x1a1   :  { %v216_v57 = vadd.f32 1e-05, %v208_v55 }
 0x1a2   :  { %231 = vperm.xlu1 %395, %v221_v56   ;;  %v260_v11 = vpop.permute.xlu0 %259 }
 0x1a3   :  { %402 = vrsqrt.f32 %v216_v57 }
 0x1a7   :  { %v399_v59 = vpop.eup %398 }
 0x1a8   :  { %v223_v61 = vmul.f32 %v399_v59, %v211_v58 }
 0x1a9   :  { %v401_v62 = vpop.eup %400 }
 0x1aa   :  { %241 = vperm.xlu1 %395, %v223_v61   ;;  %v222_v63 = vmul.f32 %v401_v62, %v210_v60 }
 0x1ac   :  { %236 = vperm.xlu0 %394, %v222_v63  }
 0x1ad   :  { %v403_v1 = vpop.eup %402 }
 0x1ae   :  { %v224_v3 = vmul.f32 %v403_v1, %v212_v0 }
 0x1b0   :  { %269 = vperm.xlu0 %394, %v255_v2   ;;  %246 = vperm.xlu1 %395, %v224_v3  }
 0x1b4   :  { %274 = vperm.xlu1 %395, %v256_v4  }
 0x221   :  { %v232_v8 = vpop.permute.xlu1 %231 }
 0x222   :  { %v249_v9 = vmul.f32 %v232_v8, %v225_v7 }
 0x224   :  { %v277_v12 = vadd.f32 %v260_v11, %v249_v9 }
 0x226   :  { %vm281_vm0 = vcmp.gt.f32.partialorder %v277_v12, 0.0  ;;  %v285_v13 = vmul.f32 0.2, %v277_v12 }
 0x228   :  { %v289_v14 = vsel %vm281_vm0, %v277_v12, %v285_v13 }
 0x229   :  { %293 = vst [vmem:[%s642_s5] sm:$0xff] %v289_v14  ;;  %v242_v18 = vpop.permute.xlu1 %241 }
 0x22a   :  { %v251_v5 = vmul.f32 %v242_v18, %v227_v20 }
 0x22b   :  { %v237_v19 = vpop.permute.xlu0 %236 }
 0x22c   :  { %v250_v21 = vmul.f32 %v237_v19, %v226_v15 }
 0x22e   :  { %v278_v22 = vadd.f32 %v265_v6, %v250_v21 }
 0x22f   :  { %v270_v23 = vpop.permute.xlu0 %269  ;;  %v247_v24 = vpop.permute.xlu1 %246 }
 0x230   :  { %vm282_vm1 = vcmp.gt.f32.partialorder %v278_v22, 0.0  ;;  %v286_v25 = vmul.f32 0.2, %v278_v22  ;;  %v279_v26 = vadd.f32 %v270_v23, %v251_v5  ;;  %v252_v16 = vmul.f32 %v247_v24, %v228_v27 }
 0x232   :  { %v290_v28 = vsel %vm282_vm1, %v278_v22, %v286_v25  ;;  %vm283_vm2 = vcmp.gt.f32.partialorder %v279_v26, 0.0  ;;  %v287_v29 = vmul.f32 0.2, %v279_v26 }
 0x233   :  { %294 = vst [vmem:[%s642_s5 + $0x8] sm:$0xff] %v290_v28  ;;  %v275_v10 = vpop.permute.xlu1 %274 }
 0x234   :  { %v291_v30 = vsel %vm283_vm2, %v279_v26, %v287_v29  ;;  %v280_v31 = vadd.f32 %v275_v10, %v252_v16 }
 0x235   :  { %295 = vst [vmem:[%s642_s5 + $0x10] sm:$0xff] %v291_v30 }
 0x236   :  { %vm284_vm3 = vcmp.gt.f32.partialorder %v280_v31, 0.0  ;;  %v288_v32 = vmul.f32 0.2, %v280_v31 }
 0x238   :  { %v292_v33 = vsel %vm284_vm3, %v280_v31, %v288_v32 }
 0x239   :  { %296 = vst [vmem:[%s642_s5 + $0x18] sm:$0xff] %v292_v33 }

// kernel: discriminator_forward.7
= control target key start
LH: loop header
LB: loop body
LE: loop exit
PB: predicated region body
PF: predicated region fallthrough
CT: control target
= control target key end

     0   :  { %s1708_s0 = inlined_call_operand.vmem [shape: f32[64,512], index: 0, kind: input, shape index: {}]   ;;  %s1709_s1 = inlined_call_operand.vmem [shape: f32[512,32], index: 1, kind: input, shape index: {}]   ;;  %s1710_s2 = inlined_call_operand.vmem [shape: f32[64,1], index: 2, kind: input, shape index: {}]   ;;  %s1711_s3 = inlined_call_operand.vmem [shape: f32[64,1], index: 3, kind: input, shape index: {}]   ;;  %s1712_s4 = inlined_call_operand.vmem [shape: f32[64,1], index: 4, kind: input, shape index: {}]   ;;  %s1713_s5 = inlined_call_operand.vmem [shape: f32[64,32], index: 5, kind: input, shape index: {}]   ;;  %s1714_s6 = inlined_call_operand.vmem [shape: f32[32,2], index: 6, kind: input, shape index: {}]   ;;  %s1715_s7 = inlined_call_operand.<no memory space> [shape: f32[1,1], index: 7, kind: input, shape index: {}]   ;;  %s1716_s8 = inlined_call_operand.hbm [shape: f32[1,2], index: 8, kind: output, shape index: {}]  }
   0x1   :  { %v13_v0 = vstv %s1715_s7 }
   0x2   :  { %14 = vst [vmem:[#allocation2] sm:$0x1] %v13_v0 }
   0x3   :  { %v80_v1 = vld [vmem:[%s1709_s1 + $0x80] sm:$0xff]  ;;  %v81_v2 = vld [vmem:[%s1709_s1 + $0x88] sm:$0xff]  ;;  %v1130_v8 = vmov 0   ;;  %v82_v13 = vld [vmem:[%s1709_s1 + $0x90] sm:$0xff] }
   0x4   :  { %v64_v3 = vld [vmem:[%s1709_s1] sm:$0xff]  ;;  %v1006_v4 = vpack.c.bf16 %v81_v2, %v80_v1  ;;  %v65_v5 = vld [vmem:[%s1709_s1 + $0x8] sm:$0xff]  ;;  %1084 = vset.pattern.permute.xlu0 %v1130_v8  ;;  %1085 = vset.pattern.permute.xlu1 %v1130_v8  ;;  %v83_v15 = vld [vmem:[%s1709_s1 + $0x98] sm:$0xff] }
   0x5   :  { %v112_v6 = vld [vmem:[%s1709_s1 + $0x180] sm:$0xff]  ;;  %v113_v7 = vld [vmem:[%s1709_s1 + $0x188] sm:$0xff]  ;;  %v1008_v9 = vpack.c.bf16 %v65_v5, %v64_v3  ;;  %v66_v16 = vld [vmem:[%s1709_s1 + $0x10] sm:$0xff]  ;;  %v1010_v18 = vpack.c.bf16 %v83_v15, %v82_v13 }
   0x6   :  { %v1038_v10 = vpack.c.bf16 %v113_v7, %v112_v6  ;;  %v96_v11 = vld [vmem:[%s1709_s1 + $0x100] sm:$0xff]  ;;  %v97_v12 = vld [vmem:[%s1709_s1 + $0x108] sm:$0xff]  ;;  %1007 = vmatprep.subr.bf16.mxu0 %v1006_v4  ;;  %v67_v17 = vld [vmem:[%s1709_s1 + $0x18] sm:$0xff] }
   0x7   :  { %v1040_v14 = vpack.c.bf16 %v97_v12, %v96_v11  ;;  %1009 = vmatpush3.bf16.msra.mxu0 %v1008_v9  ;;  %v1012_v19 = vpack.c.bf16 %v67_v17, %v66_v16  ;;  %v114_v20 = vld [vmem:[%s1709_s1 + $0x190] sm:$0xff]  ;;  %v115_v21 = vld [vmem:[%s1709_s1 + $0x198] sm:$0xff]  ;;  %v84_v25 = vld [vmem:[%s1709_s1 + $0xa0] sm:$0xff] }
   0x8   :  { %1039 = vmatprep.subr.bf16.mxu1 %v1038_v10  ;;  %v98_v22 = vld [vmem:[%s1709_s1 + $0x110] sm:$0xff]  ;;  %v1042_v23 = vpack.c.bf16 %v115_v21, %v114_v20  ;;  %v99_v24 = vld [vmem:[%s1709_s1 + $0x118] sm:$0xff]  ;;  %v85_v26 = vld [vmem:[%s1709_s1 + $0xa8] sm:$0xff]  ;;  %1011 = vmatprep.subr.bf16.mxu0 %v1010_v18 }
   0x9   :  { %1041 = vmatpush3.bf16.msra.mxu1 %v1040_v14  ;;  %v1044_v27 = vpack.c.bf16 %v99_v24, %v98_v22  ;;  %v1014_v28 = vpack.c.bf16 %v85_v26, %v84_v25  ;;  %v68_v29 = vld [vmem:[%s1709_s1 + $0x20] sm:$0xff]  ;;  %v69_v30 = vld [vmem:[%s1709_s1 + $0x28] sm:$0xff]  ;;  %v86_v37 = vld [vmem:[%s1709_s1 + $0xb0] sm:$0xff] }
   0xa   :  { %v116_v31 = vld [vmem:[%s1709_s1 + $0x1a0] sm:$0xff]  ;;  %1043 = vmatprep.subr.bf16.mxu1 %v1042_v23  ;;  %v117_v32 = vld [vmem:[%s1709_s1 + $0x1a8] sm:$0xff]  ;;  %v1016_v35 = vpack.c.bf16 %v69_v30, %v68_v29  ;;  %v87_v38 = vld [vmem:[%s1709_s1 + $0xb8] sm:$0xff] }
   0xb   :  { %v100_v33 = vld [vmem:[%s1709_s1 + $0x120] sm:$0xff]  ;;  %v101_v34 = vld [vmem:[%s1709_s1 + $0x128] sm:$0xff]  ;;  %1013 = vmatpush3.bf16.msra.mxu0 %v1012_v19  ;;  %v1046_v36 = vpack.c.bf16 %v117_v32, %v116_v31  ;;  %v70_v39 = vld [vmem:[%s1709_s1 + $0x30] sm:$0xff]  ;;  %v1018_v41 = vpack.c.bf16 %v87_v38, %v86_v37 }
   0xc   :  { %1015 = vmatprep.subr.bf16.mxu0 %v1014_v28  ;;  %v1048_v40 = vpack.c.bf16 %v101_v34, %v100_v33  ;;  %v71_v42 = vld [vmem:[%s1709_s1 + $0x38] sm:$0xff]  ;;  %v118_v43 = vld [vmem:[%s1709_s1 + $0x1b0] sm:$0xff]  ;;  %v88_v48 = vld [vmem:[%s1709_s1 + $0xc0] sm:$0xff] }
   0xd   :  { %1045 = vmatpush3.bf16.msra.mxu1 %v1044_v27  ;;  %v119_v44 = vld [vmem:[%s1709_s1 + $0x1b8] sm:$0xff]  ;;  %v102_v46 = vld [vmem:[%s1709_s1 + $0x130] sm:$0xff]  ;;  %v89_v49 = vld [vmem:[%s1709_s1 + $0xc8] sm:$0xff]  ;;  %v1020_v50 = vpack.c.bf16 %v71_v42, %v70_v39 }
   0xe   :  { %1047 = vmatprep.subr.bf16.mxu1 %v1046_v36  ;;  %v1050_v45 = vpack.c.bf16 %v119_v44, %v118_v43  ;;  %v103_v47 = vld [vmem:[%s1709_s1 + $0x138] sm:$0xff]  ;;  %v120_v51 = vld [vmem:[%s1709_s1 + $0x1c0] sm:$0xff]  ;;  %v121_v52 = vld [vmem:[%s1709_s1 + $0x1c8] sm:$0xff]  ;;  %v1022_v54 = vpack.c.bf16 %v89_v49, %v88_v48 }
   0xf   :  { %1017 = vmatpush3.bf16.msra.mxu0 %v1016_v35  ;;  %v1052_v53 = vpack.c.bf16 %v103_v47, %v102_v46  ;;  %v72_v55 = vld [vmem:[%s1709_s1 + $0x40] sm:$0xff]  ;;  %v73_v56 = vld [vmem:[%s1709_s1 + $0x48] sm:$0xff]  ;;  %v1054_v58 = vpack.c.bf16 %v121_v52, %v120_v51  ;;  %v90_v60 = vld [vmem:[%s1709_s1 + $0xd0] sm:$0xff] }
  0x10   :  { %1019 = vmatprep.subr.bf16.mxu0 %v1018_v41  ;;  %v104_v57 = vld [vmem:[%s1709_s1 + $0x140] sm:$0xff]  ;;  %v105_v59 = vld [vmem:[%s1709_s1 + $0x148] sm:$0xff]  ;;  %v91_v61 = vld [vmem:[%s1709_s1 + $0xd8] sm:$0xff]  ;;  %v1024_v0 = vpack.c.bf16 %v73_v56, %v72_v55 }
  0x11   :  { %1049 = vmatpush3.bf16.msra.mxu1 %v1048_v40  ;;  %v122_v62 = vld [vmem:[%s1709_s1 + $0x1d0] sm:$0xff]  ;;  %v123_v63 = vld [vmem:[%s1709_s1 + $0x1d8] sm:$0xff]  ;;  %v1056_v1 = vpack.c.bf16 %v105_v59, %v104_v57  ;;  %v1026_v2 = vpack.c.bf16 %v91_v61, %v90_v60  ;;  %v92_v8 = vld [vmem:[%s1709_s1 + $0xe0] sm:$0xff] }
  0x12   :  { %1051 = vmatprep.subr.bf16.mxu1 %v1050_v45  ;;  %v74_v3 = vld [vmem:[%s1709_s1 + $0x50] sm:$0xff]  ;;  %v75_v4 = vld [vmem:[%s1709_s1 + $0x58] sm:$0xff]  ;;  %v1058_v6 = vpack.c.bf16 %v123_v63, %v122_v62  ;;  %v93_v9 = vld [vmem:[%s1709_s1 + $0xe8] sm:$0xff] }
  0x13   :  { %1021 = vmatpush3.bf16.msra.mxu0 %v1020_v50  ;;  %v106_v5 = vld [vmem:[%s1709_s1 + $0x150] sm:$0xff]  ;;  %v107_v7 = vld [vmem:[%s1709_s1 + $0x158] sm:$0xff]  ;;  %v124_v10 = vld [vmem:[%s1709_s1 + $0x1e0] sm:$0xff]  ;;  %v1028_v12 = vpack.c.bf16 %v75_v4, %v74_v3  ;;  %v1030_v16 = vpack.c.bf16 %v93_v9, %v92_v8 }
  0x14   :  { %1023 = vmatprep.subr.bf16.mxu0 %v1022_v54  ;;  %v125_v11 = vld [vmem:[%s1709_s1 + $0x1e8] sm:$0xff]  ;;  %v76_v13 = vld [vmem:[%s1709_s1 + $0x60] sm:$0xff]  ;;  %v1060_v15 = vpack.c.bf16 %v107_v7, %v106_v5  ;;  %v94_v21 = vld [vmem:[%s1709_s1 + $0xf0] sm:$0xff] }
  0x15   :  { %1053 = vmatpush3.bf16.msra.mxu1 %v1052_v53  ;;  %v77_v14 = vld [vmem:[%s1709_s1 + $0x68] sm:$0xff]  ;;  %v108_v17 = vld [vmem:[%s1709_s1 + $0x160] sm:$0xff]  ;;  %v1062_v20 = vpack.c.bf16 %v125_v11, %v124_v10  ;;  %v95_v22 = vld [vmem:[%s1709_s1 + $0xf8] sm:$0xff] }
  0x16   :  { %1055 = vmatprep.subr.bf16.mxu1 %v1054_v58  ;;  %v109_v18 = vld [vmem:[%s1709_s1 + $0x168] sm:$0xff]  ;;  %v35_v23 = vld [vmem:[%s1708_s0 + $0x18] sm:$0xff]  ;;  %v126_v24 = vld [vmem:[%s1709_s1 + $0x1f0] sm:$0xff]  ;;  %v1032_v26 = vpack.c.bf16 %v77_v14, %v76_v13  ;;  %v1034_v28 = vpack.c.bf16 %v95_v22, %v94_v21 }
  0x17   :  { %1025 = vmatpush3.bf16.msra.mxu0 %v1024_v0  ;;  %v33_v19 = vld [vmem:[%s1708_s0 + $0x8] sm:$0xff]  ;;  %v127_v25 = vld [vmem:[%s1709_s1 + $0x1f8] sm:$0xff]  ;;  %345 = vmatprep.mubr.f32.mxu1 %v35_v23  ;;  %v1064_v27 = vpack.c.bf16 %v109_v18, %v108_v17  ;;  %v78_v29 = vld [vmem:[%s1709_s1 + $0x70] sm:$0xff] }
  0x18   :  { %1027 = vmatprep.subr.bf16.mxu0 %v1026_v2  ;;  %240 = vmatprep.mubr.f32.mxu0 %v33_v19  ;;  %v79_v30 = vld [vmem:[%s1709_s1 + $0x78] sm:$0xff]  ;;  %v1066_v31 = vpack.c.bf16 %v127_v25, %v126_v24  ;;  %v110_v32 = vld [vmem:[%s1709_s1 + $0x170] sm:$0xff]  ;;  %v32_v36 = vld [vmem:[%s1708_s0] sm:$0xff] }
  0x19   :  { %1057 = vmatpush3.bf16.msra.mxu1 %v1056_v1  ;;  %v111_v33 = vld [vmem:[%s1709_s1 + $0x178] sm:$0xff]  ;;  %v1036_v34 = vpack.c.bf16 %v79_v30, %v78_v29  ;;  %v128_v37 = vld [vmem:[%s1710_s2] sm:$0xff]  ;;  %v130_v38 = vld [vmem:[%s1710_s2 + $0x10] sm:$0xff] }
  0x1a   :  { %1059 = vmatprep.subr.bf16.mxu1 %v1058_v6  ;;  %v1068_v35 = vpack.c.bf16 %v111_v33, %v110_v32  ;;  %v34_v39 = vld [vmem:[%s1708_s0 + $0x10] sm:$0xff]  ;;  %v37_v40 = vld [vmem:[%s1708_s0 + $0x28] sm:$0xff]  ;;  %138 = vperm.xlu0 %1084, %v128_v37   ;;  %v39_v41 = vld [vmem:[%s1708_s0 + $0x38] sm:$0xff] }
  0x1b   :  { %1029 = vmatpush3.bf16.msra.mxu0 %v1028_v12  ;;  %v129_v42 = vld [vmem:[%s1710_s2 + $0x8] sm:$0xff]  ;;  %148 = vperm.xlu1 %1085, %v130_v38  }
  0x1c   :  { %1031 = vmatprep.subr.bf16.mxu0 %v1030_v16 }
  0x1d   :  { %1061 = vmatpush3.bf16.msra.mxu1 %v1060_v15 }
  0x1e   :  { %1063 = vmatprep.subr.bf16.mxu1 %v1062_v20 }
  0x1f   :  { %1033 = vmatpush3.bf16.msra.mxu0 %v1032_v26 }
  0x20   :  { %1035 = vmatprep.subr.bf16.mxu0 %v1034_v28 }
  0x21   :  { %1065 = vmatpush3.bf16.msra.mxu1 %v1064_v27 }
  0x22   :  { %1067 = vmatprep.subr.bf16.mxu1 %v1066_v31 }
  0x23   :  { %1037 = vmatpush3.bf16.msra.mxu0 %v1036_v34 }
  0x25   :  { %1069 = vmatpush3.bf16.msra.mxu1 %v1068_v35 }
  0x26   :  { %15 = vsyncpa [#allocation4], 0  ;;  %241 = vmatmul.mubr.f32.vlgmr.msra.gmra.mrb[0].mxu0 %v32_v36  ;;  %v131_v43 = vld [vmem:[%s1710_s2 + $0x18] sm:$0xff]  ;;  %v36_v44 = vld [vmem:[%s1708_s0 + $0x20] sm:$0xff]  ;;  %143 = vperm.xlu0 %1084, %v129_v42   ;;  %vm386_vm0 = vcmask 261120   ;;  %vm800_vm9 = vcmask 15360  }
  0x27   :  { %245 = vmatprep.mubr.f32.mxu0 %v37_v40  ;;  %v38_v45 = vld [vmem:[%s1708_s0 + $0x30] sm:$0xff]  ;;  %v41_v46 = vld [vmem:[%s1708_s0 + $0x48] sm:$0xff]  ;;  %v43_v47 = vld [vmem:[%s1708_s0 + $0x58] sm:$0xff]  ;;  %153 = vperm.xlu1 %1085, %v131_v43   ;;  %vm838_vm10 = vcmask 8192  }
  0x28   :  { %346 = vmatmul.mubr.f32.vlgmr.msra.gmra.mrb[0].mxu1 %v34_v39  ;;  %v132_v48 = vld [vmem:[%s1710_s2 + $0x20] sm:$0xff]  ;;  %v133_v49 = vld [vmem:[%s1710_s2 + $0x28] sm:$0xff]  ;;  %v42_v51 = vld [vmem:[%s1708_s0 + $0x50] sm:$0xff] }
  0x29   :  { %350 = vmatprep.mubr.f32.mxu1 %v39_v41  ;;  %v40_v50 = vld [vmem:[%s1708_s0 + $0x40] sm:$0xff]  ;;  %v45_v52 = vld [vmem:[%s1708_s0 + $0x68] sm:$0xff]  ;;  %v47_v53 = vld [vmem:[%s1708_s0 + $0x78] sm:$0xff] }
  0x2a   :  { %246 = vmatmul.mubr.f32.gmra.mrb[2].mxu0 %v36_v44  ;;  %158 = vperm.xlu0 %1084, %v132_v48   ;;  %v134_v54 = vld [vmem:[%s1710_s2 + $0x30] sm:$0xff]  ;;  %v135_v55 = vld [vmem:[%s1710_s2 + $0x38] sm:$0xff]  ;;  %v44_v56 = vld [vmem:[%s1708_s0 + $0x60] sm:$0xff] }
  0x2b   :  { %250 = vmatprep.mubr.f32.mxu0 %v41_v46  ;;  %163 = vperm.xlu1 %1085, %v133_v49   ;;  %v46_v57 = vld [vmem:[%s1708_s0 + $0x70] sm:$0xff]  ;;  %v49_v58 = vld [vmem:[%s1708_s0 + $0x88] sm:$0xff]  ;;  %v51_v59 = vld [vmem:[%s1708_s0 + $0x98] sm:$0xff] }
  0x2c   :  { %351 = vmatmul.mubr.f32.gmra.mrb[2].mxu1 %v38_v45  ;;  %v48_v60 = vld [vmem:[%s1708_s0 + $0x80] sm:$0xff]  ;;  %v50_v61 = vld [vmem:[%s1708_s0 + $0x90] sm:$0xff]  ;;  %v53_v62 = vld [vmem:[%s1708_s0 + $0xa8] sm:$0xff] }
  0x2d   :  { %355 = vmatprep.mubr.f32.mxu1 %v43_v47  ;;  %v55_v63 = vld [vmem:[%s1708_s0 + $0xb8] sm:$0xff]  ;;  %v52_v0 = vld [vmem:[%s1708_s0 + $0xa0] sm:$0xff]  ;;  %v54_v1 = vld [vmem:[%s1708_s0 + $0xb0] sm:$0xff] }
  0x2e   :  { %251 = vmatmul.mubr.f32.gmra.mrb[4].mxu0 %v40_v50  ;;  %168 = vperm.xlu0 %1084, %v134_v54   ;;  %v57_v2 = vld [vmem:[%s1708_s0 + $0xc8] sm:$0xff]  ;;  %v59_v3 = vld [vmem:[%s1708_s0 + $0xd8] sm:$0xff]  ;;  %v56_v4 = vld [vmem:[%s1708_s0 + $0xc0] sm:$0xff] }
  0x2f   :  { %255 = vmatprep.mubr.f32.mxu0 %v45_v52  ;;  %173 = vperm.xlu1 %1085, %v135_v55   ;;  %v58_v5 = vld [vmem:[%s1708_s0 + $0xd0] sm:$0xff]  ;;  %v61_v6 = vld [vmem:[%s1708_s0 + $0xe8] sm:$0xff]  ;;  %v63_v7 = vld [vmem:[%s1708_s0 + $0xf8] sm:$0xff] }
  0x30   :  { %356 = vmatmul.mubr.f32.gmra.mrb[4].mxu1 %v42_v51  ;;  %v60_v8 = vld [vmem:[%s1708_s0 + $0xe0] sm:$0xff]  ;;  %v62_v9 = vld [vmem:[%s1708_s0 + $0xf0] sm:$0xff] }
  0x31   :  { %360 = vmatprep.mubr.f32.mxu1 %v47_v53 }
  0x32   :  { %256 = vmatmul.mubr.f32.gmra.mrb[6].mxu0 %v44_v56 }
  0x33   :  { %260 = vmatprep.mubr.f32.mxu0 %v49_v58 }
  0x34   :  { %361 = vmatmul.mubr.f32.gmra.mrb[6].mxu1 %v46_v57 }
  0x35   :  { %365 = vmatprep.mubr.f32.mxu1 %v51_v59 }
  0x36   :  { %261 = vmatmul.mubr.f32.gmra.mrb[8].mxu0 %v48_v60 }
  0x37   :  { %265 = vmatprep.mubr.f32.mxu0 %v53_v62 }
  0x38   :  { %366 = vmatmul.mubr.f32.gmra.mrb[8].mxu1 %v50_v61 }
  0x39   :  { %370 = vmatprep.mubr.f32.mxu1 %v55_v63 }
  0x3a   :  { %266 = vmatmul.mubr.f32.gmra.mrb[10].mxu0 %v52_v0 }
  0x3b   :  { %270 = vmatprep.mubr.f32.mxu0 %v57_v2 }
  0x3c   :  { %371 = vmatmul.mubr.f32.gmra.mrb[10].mxu1 %v54_v1 }
  0x3d   :  { %375 = vmatprep.mubr.f32.mxu1 %v59_v3 }
  0x3e   :  { %271 = vmatmul.mubr.f32.gmra.mrb[12].mxu0 %v56_v4 }
  0x3f   :  { %275 = vmatprep.mubr.f32.mxu0 %v61_v6 }
  0x40   :  { %376 = vmatmul.mubr.f32.gmra.mrb[12].mxu1 %v58_v5 }
  0x41   :  { %380 = vmatprep.mubr.f32.mxu1 %v63_v7 }
  0x42   :  { %276 = vmatmul.mubr.f32.gmra.mrb[14].mxu0 %v60_v8 }
  0x44   :  { %381 = vmatmul.mubr.f32.gmra.mrb[14].mxu1 %v62_v9 }
  0x99   :  { %v139_v10 = vpop.permute.xlu0 %138 }
  0x9a   :  { %v149_v26 = vpop.permute.xlu1 %148 }
  0xa5   :  { %v144_v24 = vpop.permute.xlu0 %143 }
  0xa6   :  { %v154_v47 = vpop.permute.xlu1 %153 }
  0xa9   :  { %v159_v59 = vpop.permute.xlu0 %158 }
  0xaa   :  { %v164_v7 = vpop.permute.xlu1 %163 }
  0xf9   :  { %v894_v11 = vpop.f32.mrb[0].mxu0 }
  0xfa   :  { %v895_v12 = vpop.f32.mrb[1].mxu0 }
  0xfb   :  { %v950_v13 = vpop.f32.mrb[0].mxu1  ;;  %v896_v14 = vadd.f32 %v895_v12, %v894_v11 }
  0xfc   :  { %v951_v15 = vpop.f32.mrb[1].mxu1 }
  0xfd   :  { %v952_v16 = vadd.f32 %v951_v15, %v950_v13  ;;  %v243_v17 = vadd.f32 %v896_v14, %v139_v10  ;;  %v897_v18 = vpop.f32.mrb[2].mxu0 }
  0xfe   :  { %v898_v19 = vpop.f32.mrb[3].mxu0 }
  0xff   :  { %v953_v20 = vpop.f32.mrb[2].mxu1  ;;  %v1492_v21 = vadd.f32 %v952_v16, %v243_v17  ;;  %v899_v22 = vadd.f32 %v898_v19, %v897_v18  ;;  %v169_v19 = vpop.permute.xlu0 %168 }
 0x100   :  { %v954_v23 = vpop.f32.mrb[3].mxu1 }
 0x101   :  { %v955_v25 = vadd.f32 %v954_v23, %v953_v20  ;;  %v248_v27 = vadd.f32 %v899_v22, %v144_v24  ;;  %v900_v28 = vpop.f32.mrb[4].mxu0  ;;  %v387_v29 = vsel %vm386_vm0, %v1492_v21, 0.0  ;;  %v419_v30 = vmul.f32 %v1492_v21, %v1492_v21 }
 0x102   :  { %v901_v31 = vpop.f32.mrb[5].mxu0  ;;  %388 = vadd.xlane.f32.xlu0 %v387_v29 }
 0x103   :  { %v956_v32 = vpop.f32.mrb[4].mxu1  ;;  %v1498_v33 = vadd.f32 %v955_v25, %v248_v27  ;;  %v902_v34 = vadd.f32 %v901_v31, %v900_v28  ;;  %v427_v40 = vsel %vm386_vm0, %v419_v30, 0.0 }
 0x104   :  { %v957_v35 = vpop.f32.mrb[5].mxu1 }
 0x105   :  { %v958_v36 = vadd.f32 %v957_v35, %v956_v32  ;;  %v253_v37 = vadd.f32 %v902_v34, %v149_v26  ;;  %v903_v38 = vpop.f32.mrb[6].mxu0  ;;  %v390_v39 = vsel %vm386_vm0, %v1498_v33, 0.0  ;;  %v420_v41 = vmul.f32 %v1498_v33, %v1498_v33  ;;  %v174_v32 = vpop.permute.xlu1 %173 }
 0x106   :  { %v904_v42 = vpop.f32.mrb[7].mxu0  ;;  %391 = vadd.xlane.f32.xlu1 %v390_v39  ;;  %428 = vadd.xlane.f32.xlu0 %v427_v40 }
 0x107   :  { %v959_v43 = vpop.f32.mrb[6].mxu1  ;;  %v1505_v44 = vadd.f32 %v958_v36, %v253_v37  ;;  %v905_v45 = vadd.f32 %v904_v42, %v903_v38  ;;  %v430_v52 = vsel %vm386_vm0, %v420_v41, 0.0 }
 0x108   :  { %v960_v46 = vpop.f32.mrb[7].mxu1 }
 0x109   :  { %v961_v48 = vadd.f32 %v960_v46, %v959_v43  ;;  %v258_v49 = vadd.f32 %v905_v45, %v154_v47  ;;  %v906_v50 = vpop.f32.mrb[8].mxu0  ;;  %v393_v51 = vsel %vm386_vm0, %v1505_v44, 0.0  ;;  %v421_v53 = vmul.f32 %v1505_v44, %v1505_v44  ;;  %v571_v45 = vld [vmem:[%s1712_s4] sm:$0xff]  ;;  %v572_v46 = vld [vmem:[%s1712_s4 + $0x8] sm:$0xff]  ;;  %v574_v47 = vld [vmem:[%s1712_s4 + $0x18] sm:$0xff] }
 0x10a   :  { %v907_v54 = vpop.f32.mrb[9].mxu0  ;;  %394 = vadd.xlane.f32.xlu1 %v393_v51  ;;  %431 = vadd.xlane.f32.xlu0 %v430_v52  ;;  %v667_v51 = vld [vmem:[%s1714_s6] sm:$0xff]  ;;  %v668_v52 = vld [vmem:[%s1714_s6 + $0x8] sm:$0xff] }
 0x10b   :  { %v962_v55 = vpop.f32.mrb[8].mxu1  ;;  %v1512_v56 = vadd.f32 %v961_v48, %v258_v49  ;;  %v908_v57 = vadd.f32 %v907_v54, %v906_v50  ;;  %v433_v63 = vsel %vm386_vm0, %v421_v53, 0.0  ;;  %v573_v48 = vld [vmem:[%s1712_s4 + $0x10] sm:$0xff]  ;;  %v576_v49 = vld [vmem:[%s1712_s4 + $0x28] sm:$0xff]  ;;  %v575_v50 = vld [vmem:[%s1712_s4 + $0x20] sm:$0xff]  ;;  %v1070_v53 = vpack.c.bf16 %v668_v52, %v667_v51 }
 0x10c   :  { %v963_v58 = vpop.f32.mrb[9].mxu1 }
 0x10d   :  { %v964_v60 = vadd.f32 %v963_v58, %v962_v55  ;;  %v263_v61 = vadd.f32 %v908_v57, %v159_v59  ;;  %v909_v62 = vpop.f32.mrb[10].mxu0  ;;  %v396_v0 = vsel %vm386_vm0, %v1512_v56, 0.0  ;;  %v422_v1 = vmul.f32 %v1512_v56, %v1512_v56  ;;  %1071 = vmatprep.subr.bf16.mxu0 %v1070_v53  ;;  %1078 = vmatprep.subr.bf16.mxu1 %v1070_v53 }
 0x10e   :  { %v910_v2 = vpop.f32.mrb[11].mxu0  ;;  %434 = vadd.xlane.f32.xlu1 %v433_v63  ;;  %397 = vadd.xlane.f32.xlu0 %v396_v0 }
 0x10f   :  { %v965_v3 = vpop.f32.mrb[10].mxu1  ;;  %v1519_v4 = vadd.f32 %v964_v60, %v263_v61  ;;  %v911_v5 = vadd.f32 %v910_v2, %v909_v62  ;;  %v436_v12 = vsel %vm386_vm0, %v422_v1, 0.0  ;;  %1073 = vmatpush3.bf16.msra.mxu0 %v1070_v53  ;;  %1080 = vmatpush3.bf16.msra.mxu1 %v1070_v53 }
 0x110   :  { %v966_v6 = vpop.f32.mrb[11].mxu1 }
 0x111   :  { %v967_v8 = vadd.f32 %v966_v6, %v965_v3  ;;  %v268_v9 = vadd.f32 %v911_v5, %v164_v7  ;;  %v912_v10 = vpop.f32.mrb[12].mxu0  ;;  %v399_v11 = vsel %vm386_vm0, %v1519_v4, 0.0  ;;  %v423_v13 = vmul.f32 %v1519_v4, %v1519_v4 }
 0x112   :  { %v913_v14 = vpop.f32.mrb[13].mxu0  ;;  %400 = vadd.xlane.f32.xlu1 %v399_v11  ;;  %437 = vadd.xlane.f32.xlu0 %v436_v12 }
 0x113   :  { %v968_v15 = vpop.f32.mrb[12].mxu1  ;;  %v1526_v16 = vadd.f32 %v967_v8, %v268_v9  ;;  %v914_v17 = vadd.f32 %v913_v14, %v912_v10  ;;  %v439_v24 = vsel %vm386_vm0, %v423_v13, 0.0 }
 0x114   :  { %v969_v18 = vpop.f32.mrb[13].mxu1 }
 0x115   :  { %v970_v20 = vadd.f32 %v969_v18, %v968_v15  ;;  %v273_v22 = vadd.f32 %v914_v17, %v169_v19  ;;  %v915_v23 = vpop.f32.mrb[14].mxu0  ;;  %v402_v25 = vsel %vm386_vm0, %v1526_v16, 0.0  ;;  %v424_v26 = vmul.f32 %v1526_v16, %v1526_v16 }
 0x116   :  { %v916_v27 = vpop.f32.mrb[15].mxu0  ;;  %440 = vadd.xlane.f32.xlu1 %v439_v24  ;;  %403 = vadd.xlane.f32.xlu0 %v402_v25 }
 0x117   :  { %v971_v28 = vpop.f32.mrb[14].mxu1  ;;  %v1533_v29 = vadd.f32 %v970_v20, %v273_v22  ;;  %v917_v30 = vadd.f32 %v916_v27, %v915_v23  ;;  %v442_v37 = vsel %vm386_vm0, %v424_v26, 0.0 }
 0x118   :  { %v972_v31 = vpop.f32.mrb[15].mxu1 }
 0x119   :  { %v973_v34 = vadd.f32 %v972_v31, %v971_v28  ;;  %v278_v35 = vadd.f32 %v917_v30, %v174_v32  ;;  %v405_v36 = vsel %vm386_vm0, %v1533_v29, 0.0  ;;  %v425_v38 = vmul.f32 %v1533_v29, %v1533_v29 }
 0x11a   :  { %406 = vadd.xlane.f32.xlu1 %v405_v36  ;;  %443 = vadd.xlane.f32.xlu0 %v442_v37 }
 0x11b   :  { %v1540_v39 = vadd.f32 %v973_v34, %v278_v35  ;;  %v445_v40 = vsel %vm386_vm0, %v425_v38, 0.0  ;;  %v483_v34 = vld [vmem:[%s1711_s3] sm:$0xff] }
 0x11d   :  { %v408_v41 = vsel %vm386_vm0, %v1540_v39, 0.0  ;;  %v426_v42 = vmul.f32 %v1540_v39, %v1540_v39 }
 0x11e   :  { %446 = vadd.xlane.f32.xlu1 %v445_v40  ;;  %409 = vadd.xlane.f32.xlu0 %v408_v41 }
 0x11f   :  { %v448_v43 = vsel %vm386_vm0, %v426_v42, 0.0 }
 0x122   :  { %449 = vadd.xlane.f32.xlu0 %v448_v43 }
 0x12f   :  { %581 = vperm.xlu1 %1085, %v571_v45  }
 0x133   :  { %586 = vperm.xlu1 %1085, %v572_v46  }
 0x137   :  { %596 = vperm.xlu1 %1085, %v574_v47   ;;  %v484_v47 = vld [vmem:[%s1711_s3 + $0x8] sm:$0xff] }
 0x138   :  { %591 = vperm.xlu0 %1084, %v573_v48  }
 0x13b   :  { %606 = vperm.xlu1 %1085, %v576_v49  }
 0x13c   :  { %601 = vperm.xlu0 %1084, %v575_v50  }
 0x18f   :  { %v389_v54 = vpop.xlane.xlu0 %388 }
 0x190   :  { %v1572_v55 = vmul.f32 0.03125, %v389_v54 }
 0x192   :  { %v459_v59 = vmul.f32 %v1572_v55, %v1572_v55 }
 0x193   :  { %v392_v57 = vpop.xlane.xlu1 %391  ;;  %v429_v58 = vpop.xlane.xlu0 %428 }
 0x194   :  { %v1576_v60 = vmul.f32 0.03125, %v392_v57  ;;  %v451_v61 = vmul.f32 0.03125, %v429_v58 }
 0x196   :  { %v467_v62 = vsub.f32 %v451_v61, %v459_v59  ;;  %v460_v1 = vmul.f32 %v1576_v60, %v1576_v60  ;;  %v485_v61 = vld [vmem:[%s1711_s3 + $0x10] sm:$0xff] }
 0x197   :  { %v395_v63 = vpop.xlane.xlu1 %394  ;;  %v432_v0 = vpop.xlane.xlu0 %431 }
 0x198   :  { %v475_v2 = vmax.f32 %v467_v62, 0.0  ;;  %v1580_v3 = vmul.f32 0.03125, %v395_v63  ;;  %v452_v5 = vmul.f32 0.03125, %v432_v0 }
 0x19a   :  { %v491_v6 = vadd.f32 1e-05, %v475_v2  ;;  %v468_v7 = vsub.f32 %v452_v5, %v460_v1  ;;  %v461_v8 = vmul.f32 %v1580_v3, %v1580_v3 }
 0x19b   :  { %v435_v9 = vpop.xlane.xlu1 %434  ;;  %v398_v10 = vpop.xlane.xlu0 %397 }
 0x19c   :  { %1086 = vrsqrt.f32 %v491_v6  ;;  %v476_v11 = vmax.f32 %v468_v7, 0.0  ;;  %v453_v12 = vmul.f32 0.03125, %v435_v9  ;;  %v1584_v13 = vmul.f32 0.03125, %v398_v10  ;;  %v669_v6 = vld [vmem:[%s1714_s6 + $0x10] sm:$0xff]  ;;  %v670_v7 = vld [vmem:[%s1714_s6 + $0x18] sm:$0xff] }
 0x19d   :  { %v486_v10 = vld [vmem:[%s1711_s3 + $0x18] sm:$0xff] }
 0x19e   :  { %v492_v14 = vadd.f32 1e-05, %v476_v11  ;;  %v469_v15 = vsub.f32 %v453_v12, %v461_v8  ;;  %v462_v17 = vmul.f32 %v1584_v13, %v1584_v13  ;;  %v1074_v11 = vpack.c.bf16 %v670_v7, %v669_v6 }
 0x19f   :  { %v401_v18 = vpop.xlane.xlu1 %400  ;;  %v438_v19 = vpop.xlane.xlu0 %437  ;;  %v518_v6 = vsub.f32 %v1512_v56, %v1584_v13 }
 0x1a0   :  { %1088 = vrsqrt.f32 %v492_v14  ;;  %v477_v20 = vmax.f32 %v469_v15, 0.0  ;;  %v1588_v22 = vmul.f32 0.03125, %v401_v18  ;;  %v454_v23 = vmul.f32 0.03125, %v438_v19  ;;  %1075 = vmatprep.subr.bf16.mxu0 %v1074_v11  ;;  %1079 = vmatprep.subr.bf16.mxu1 %v1074_v11  ;;  %v487_v19 = vld [vmem:[%s1711_s3 + $0x20] sm:$0xff] }
 0x1a1   :  { %1077 = vmatpush3.bf16.msra.mxu0 %v1074_v11  ;;  %1081 = vmatpush3.bf16.msra.mxu1 %v1074_v11 }
 0x1a2   :  { %v493_v24 = vadd.f32 1e-05, %v477_v20  ;;  %v470_v25 = vsub.f32 %v454_v23, %v462_v17  ;;  %v463_v26 = vmul.f32 %v1588_v22, %v1588_v22 }
 0x1a3   :  { %v441_v27 = vpop.xlane.xlu1 %440  ;;  %v404_v28 = vpop.xlane.xlu0 %403 }
 0x1a4   :  { %1090 = vrsqrt.f32 %v493_v24  ;;  %v478_v30 = vmax.f32 %v470_v25, 0.0  ;;  %v455_v31 = vmul.f32 0.03125, %v441_v27  ;;  %v1592_v32 = vmul.f32 0.03125, %v404_v28  ;;  %v488_v25 = vld [vmem:[%s1711_s3 + $0x28] sm:$0xff]  ;;  %v489_v28 = vld [vmem:[%s1711_s3 + $0x30] sm:$0xff] }
 0x1a6   :  { %v1087_v35 = vpop.eup %1086  ;;  %v494_v36 = vadd.f32 1e-05, %v478_v30  ;;  %v471_v37 = vsub.f32 %v455_v31, %v463_v26  ;;  %v464_v38 = vmul.f32 %v1592_v32, %v1592_v32 }
 0x1a7   :  { %v407_v40 = vpop.xlane.xlu1 %406  ;;  %v444_v41 = vpop.xlane.xlu0 %443  ;;  %v507_v42 = vmul.f32 %v1087_v35, %v483_v34  ;;  %v490_v34 = vld [vmem:[%s1711_s3 + $0x38] sm:$0xff] }
 0x1a8   :  { %1092 = vrsqrt.f32 %v494_v36  ;;  %v479_v43 = vmax.f32 %v471_v37, 0.0  ;;  %v1599_v45 = vmul.f32 0.03125, %v407_v40  ;;  %v456_v46 = vmul.f32 0.03125, %v444_v41  ;;  %v577_v36 = vld [vmem:[%s1712_s4 + $0x30] sm:$0xff]  ;;  %v578_v40 = vld [vmem:[%s1712_s4 + $0x38] sm:$0xff] }
 0x1a9   :  { %525 = vperm.xlu1 %1085, %v507_v42  }
 0x1aa   :  { %v1089_v48 = vpop.eup %1088  ;;  %v495_v49 = vadd.f32 1e-05, %v479_v43  ;;  %v472_v50 = vsub.f32 %v456_v46, %v464_v38  ;;  %v465_v51 = vmul.f32 %v1599_v45, %v1599_v45  ;;  %v822_v38 = vld [vmem:[#allocation2] sm:$0x1] }
 0x1ab   :  { %v447_v52 = vpop.xlane.xlu1 %446  ;;  %v410_v53 = vpop.xlane.xlu0 %409  ;;  %v508_v54 = vmul.f32 %v1089_v48, %v484_v47  ;;  %v515_v48 = vsub.f32 %v1492_v21, %v1572_v55  ;;  %v517_v21 = vsub.f32 %v1505_v44, %v1580_v3 }
 0x1ac   :  { %1094 = vrsqrt.f32 %v495_v49  ;;  %v480_v57 = vmax.f32 %v472_v50, 0.0  ;;  %v457_v58 = vmul.f32 0.03125, %v447_v52  ;;  %v1606_v59 = vmul.f32 0.03125, %v410_v53 }
 0x1ad   :  { %530 = vperm.xlu0 %1084, %v508_v54   ;;  %v516_v53 = vsub.f32 %v1498_v33, %v1576_v60 }
 0x1ae   :  { %v1091_v62 = vpop.eup %1090  ;;  %v496_v63 = vadd.f32 1e-05, %v480_v57  ;;  %v473_v0 = vsub.f32 %v457_v58, %v465_v51  ;;  %v466_v1 = vmul.f32 %v1606_v59, %v1606_v59 }
 0x1af   :  { %v450_v2 = vpop.xlane.xlu0 %449  ;;  %v509_v5 = vmul.f32 %v1091_v62, %v485_v61  ;;  %v582_v41 = vpop.permute.xlu1 %581  ;;  %v651_v61 = vld [vmem:[%s1713_s5] sm:$0xff] }
 0x1b0   :  { %1096 = vrsqrt.f32 %v496_v63  ;;  %v481_v8 = vmax.f32 %v473_v0, 0.0  ;;  %v458_v9 = vmul.f32 0.03125, %v450_v2 }
 0x1b1   :  { %535 = vperm.xlu0 %1084, %v509_v5  }
 0x1b2   :  { %v1093_v12 = vpop.eup %1092  ;;  %v497_v14 = vadd.f32 1e-05, %v481_v8  ;;  %v474_v15 = vsub.f32 %v458_v9, %v466_v1  ;;  %v652_v1 = vld [vmem:[%s1713_s5 + $0x8] sm:$0xff]  ;;  %v653_v9 = vld [vmem:[%s1713_s5 + $0x10] sm:$0xff] }
 0x1b3   :  { %v510_v17 = vmul.f32 %v1093_v12, %v486_v10  ;;  %v587_v42 = vpop.permute.xlu1 %586  ;;  %v519_v12 = vsub.f32 %v1519_v4, %v1588_v22 }
 0x1b4   :  { %1098 = vrsqrt.f32 %v497_v14  ;;  %v482_v18 = vmax.f32 %v474_v15, 0.0 }
 0x1b5   :  { %540 = vperm.xlu1 %1085, %v510_v17   ;;  %v654_v17 = vld [vmem:[%s1713_s5 + $0x18] sm:$0xff] }
 0x1b6   :  { %v1095_v20 = vpop.eup %1094  ;;  %v498_v23 = vadd.f32 1e-05, %v482_v18 }
 0x1b7   :  { %v511_v24 = vmul.f32 %v1095_v20, %v487_v19  ;;  %v597_v43 = vpop.permute.xlu1 %596  ;;  %v592_v46 = vpop.permute.xlu0 %591  ;;  %v520_v20 = vsub.f32 %v1526_v16, %v1592_v32  ;;  %v521_v32 = vsub.f32 %v1533_v29, %v1599_v45 }
 0x1b8   :  { %1100 = vrsqrt.f32 %v498_v23 }
 0x1b9   :  { %545 = vperm.xlu0 %1084, %v511_v24  }
 0x1ba   :  { %v1097_v26 = vpop.eup %1096 }
 0x1bb   :  { %v512_v27 = vmul.f32 %v1097_v26, %v488_v25  ;;  %v607_v47 = vpop.permute.xlu1 %606  ;;  %v602_v49 = vpop.permute.xlu0 %601  ;;  %v655_v25 = vld [vmem:[%s1713_s5 + $0x20] sm:$0xff] }
 0x1bd   :  { %550 = vperm.xlu1 %1085, %v512_v27  }
 0x1be   :  { %v1099_v30 = vpop.eup %1098 }
 0x1bf   :  { %v513_v31 = vmul.f32 %v1099_v30, %v489_v28 }
 0x1c1   :  { %555 = vperm.xlu0 %1084, %v513_v31   ;;  %v656_v31 = vld [vmem:[%s1713_s5 + $0x28] sm:$0xff] }
 0x1c2   :  { %v1101_v35 = vpop.eup %1100 }
 0x1c3   :  { %v514_v37 = vmul.f32 %v1101_v35, %v490_v34 }
 0x1c5   :  { %611 = vperm.xlu0 %1084, %v577_v36   ;;  %560 = vperm.xlu1 %1085, %v514_v37  }
 0x1c9   :  { %825 = vperm.xlu0 %1084, %v822_v38   ;;  %616 = vperm.xlu1 %1085, %v578_v40   ;;  %v522_v40 = vsub.f32 %v1540_v39, %v1606_v59 }
 0x228   :  { %v526_v50 = vpop.permute.xlu1 %525 }
 0x229   :  { %v563_v51 = vmul.f32 %v526_v50, %v515_v48 }
 0x22b   :  { %v619_v52 = vadd.f32 %v582_v41, %v563_v51 }
 0x22c   :  { %v531_v54 = vpop.permute.xlu0 %530 }
 0x22d   :  { %vm627_vm1 = vcmp.gt.f32.partialorder %v619_v52, 0.0  ;;  %v635_v57 = vmul.f32 0.2, %v619_v52  ;;  %v564_v58 = vmul.f32 %v531_v54, %v516_v53 }
 0x22f   :  { %v643_v62 = vsel %vm627_vm1, %v619_v52, %v635_v57  ;;  %v620_v63 = vadd.f32 %v587_v42, %v564_v58 }
 0x230   :  { %v536_v55 = vpop.permute.xlu0 %535  ;;  %v659_v0 = vmul.f32 %v651_v61, %v643_v62 }
 0x231   :  { %vm628_vm2 = vcmp.gt.f32.partialorder %v620_v63, 0.0  ;;  %v636_v33 = vmul.f32 0.2, %v620_v63  ;;  %v565_v60 = vmul.f32 %v536_v55, %v517_v21 }
 0x232   :  { %994 = vmatprep.mubr.msk.f32.mxu0 %vm386_vm0, %v659_v0 }
 0x233   :  { %v644_v2 = vsel %vm628_vm2, %v620_v63, %v636_v33  ;;  %v621_v5 = vadd.f32 %v592_v46, %v565_v60 }
 0x234   :  { %v660_v7 = vmul.f32 %v652_v1, %v644_v2  ;;  %v541_v8 = vpop.permute.xlu1 %540 }
 0x235   :  { %vm629_vm3 = vcmp.gt.f32.partialorder %v621_v5, 0.0  ;;  %v637_v44 = vmul.f32 0.2, %v621_v5  ;;  %v566_v3 = vmul.f32 %v541_v8, %v518_v6 }
 0x236   :  { %995 = vmatmul.mubr.msk.f32.vlgmr.msra.gmra.mrb[16].mxu0 %vm386_vm0, %v660_v7 }
 0x237   :  { %v645_v10 = vsel %vm629_vm3, %v621_v5, %v637_v44  ;;  %v622_v11 = vadd.f32 %v597_v43, %v566_v3  ;;  %v657_v43 = vld [vmem:[%s1713_s5 + $0x30] sm:$0xff] }
 0x238   :  { %v546_v14 = vpop.permute.xlu0 %545  ;;  %v661_v15 = vmul.f32 %v653_v9, %v645_v10  ;;  %v828_v9 = vlaneseq }
 0x239   :  { %vm630_vm4 = vcmp.gt.f32.partialorder %v622_v11, 0.0  ;;  %v638_v56 = vmul.f32 0.2, %v622_v11  ;;  %v567_v13 = vmul.f32 %v546_v14, %v519_v12 }
 0x23a   :  { %997 = vmatprep.mubr.msk.f32.mxu0 %vm386_vm0, %v661_v15  ;;  %v829_v12 = vshrl.u32 %v828_v9, 7 }
 0x23b   :  { %v646_v18 = vsel %vm630_vm4, %v622_v11, %v638_v56  ;;  %v623_v19 = vadd.f32 %v602_v49, %v567_v13  ;;  %v658_v49 = vld [vmem:[%s1713_s5 + $0x38] sm:$0xff]  ;;  %s1131_s5 = smov [#allocation3]  }
 0x23c   :  { %v551_v23 = vpop.permute.xlu1 %550  ;;  %v662_v24 = vmul.f32 %v654_v17, %v646_v18  ;;  %v830_v56 = vsub.s32 0, %v829_v12  ;;  %s846_s25 = sshll.u32 %s1131_s5, 4  ;;  %s847_s25 = int_to_ptr.vmem [resolvable:$true] %s846_s25 }
 0x23d   :  { %vm631_vm5 = vcmp.gt.f32.partialorder %v623_v19, 0.0  ;;  %v639_v4 = vmul.f32 0.2, %v623_v19  ;;  %v568_v22 = vmul.f32 %v551_v23, %v520_v20  ;;  %s1106_s6 = scalar_lea.vmem %s847_s25, 16  ;;  %s1110_s26 = scalar_lea.vmem %s847_s25, 32 }
 0x23e   :  { %998 = vmatmul.mubr.msk.f32.gmra.mrb[18].mxu0 %vm386_vm0, %v662_v24  ;;  %p1107_p0 = scmp.ne.s32.totalorder %s847_s25, %s1106_s6  ;;  %p1111_p1 = scmp.lt.s32.totalorder %s847_s25, %s847_s25 }
 0x23f   :  { %v647_v26 = vsel %vm631_vm5, %v623_v19, %v639_v4  ;;  %v624_v27 = vadd.f32 %v607_v47, %v568_v22  ;;  %p1112_p2 = scmp.lt.s32.totalorder %s1110_s26, %s1106_s6 }
 0x240   :  { %v556_v28 = vpop.permute.xlu0 %555  ;;  %v663_v30 = vmul.f32 %v655_v25, %v647_v26 }
 0x241   :  { %vm632_vm6 = vcmp.gt.f32.partialorder %v624_v27, 0.0  ;;  %v640_v16 = vmul.f32 0.2, %v624_v27  ;;  %v569_v35 = vmul.f32 %v556_v28, %v521_v32  ;;  %p1113_p3 = por %p1112_p2, %p1111_p1 }
 0x242   :  { %1000 = vmatprep.mubr.msk.f32.mxu1 %vm386_vm0, %v663_v30 }
 0x243   :  { %v648_v34 = vsel %vm632_vm6, %v624_v27, %v640_v16  ;;  %p1114_p4 = pnand %p1113_p3, %p1107_p0 }
 0x244   :  { %v664_v36 = vmul.f32 %v656_v31, %v648_v34  ;;  %v561_v37 = vpop.permute.xlu1 %560  ;;  %v612_v38 = vpop.permute.xlu0 %611 }
 0x245   :  { %v625_v41 = vadd.f32 %v612_v38, %v569_v35  ;;  %v570_v42 = vmul.f32 %v561_v37, %v522_v40 }
 0x246   :  { %1001 = vmatmul.mubr.msk.f32.vlgmr.msra.gmra.mrb[16].mxu1 %vm386_vm0, %v664_v36 }
 0x247   :  { %vm633_vm7 = vcmp.gt.f32.partialorder %v625_v41, 0.0  ;;  %v641_v29 = vmul.f32 0.2, %v625_v41 }
 0x248   :  { %v617_v45 = vpop.permute.xlu1 %616  ;;  %v826_v17 = vpop.permute.xlu0 %825 }
 0x249   :  { %v649_v46 = vsel %vm633_vm7, %v625_v41, %v641_v29  ;;  %v626_v47 = vadd.f32 %v617_v45, %v570_v42  ;;  %v831_v19 = vrot.slane %v826_v17, %v830_v56 }
 0x24a   :  { %v665_v48 = vmul.f32 %v657_v43, %v649_v46 }
 0x24b   :  { %vm634_vm8 = vcmp.gt.f32.partialorder %v626_v47, 0.0  ;;  %v642_v39 = vmul.f32 0.2, %v626_v47 }
 0x24c   :  { %1003 = vmatprep.mubr.msk.f32.mxu1 %vm386_vm0, %v665_v48 }
 0x24d   :  { %v650_v59 = vsel %vm634_vm8, %v626_v47, %v642_v39 }
 0x24e   :  { %v666_v50 = vmul.f32 %v658_v49, %v650_v59 }
 0x250   :  { %1004 = vmatmul.mubr.msk.f32.gmra.mrb[18].mxu1 %vm386_vm0, %v666_v50 }
 0x309   :  { %v996_v51 = vpop.f32.mrb[16].mxu0 }
 0x30a   :  { %v802_v52 = vsel %vm800_vm9, %v996_v51, 0.0  ;;  %v761_v53 = vpop.f32.mrb[17].mxu0 }
 0x30b   :  { %v801_v54 = vsel %vm800_vm9, %v761_v53, 0.0 }
 0x30c   :  { %v803_v57 = vadd.f32 %v802_v52, %v801_v54 }
 0x311   :  { %v999_v58 = vpop.f32.mrb[18].mxu0 }
 0x312   :  { %v771_v61 = vpop.f32.mrb[19].mxu0  ;;  %v806_v21 = vsel %vm800_vm9, %v999_v58, 0.0 }
 0x313   :  { %v804_v62 = vsel %vm800_vm9, %v771_v61, 0.0 }
 0x314   :  { %v805_v63 = vadd.f32 %v804_v62, %v803_v57 }
 0x316   :  { %v807_v55 = vadd.f32 %v806_v21, %v805_v63 }
 0x319   :  { %v1002_v0 = vpop.f32.mrb[16].mxu1 }
 0x31a   :  { %v781_v1 = vpop.f32.mrb[17].mxu1  ;;  %v810_v2 = vsel %vm800_vm9, %v1002_v0, 0.0 }
 0x31b   :  { %v808_v33 = vsel %vm800_vm9, %v781_v1, 0.0 }
 0x31c   :  { %v809_v60 = vadd.f32 %v808_v33, %v807_v55 }
 0x31e   :  { %v811_v5 = vadd.f32 %v810_v2, %v809_v60 }
 0x323   :  { %v1005_v6 = vpop.f32.mrb[18].mxu1 }
 0x324   :  { %v791_v7 = vpop.f32.mrb[19].mxu1  ;;  %v814_v3 = vsel %vm800_vm9, %v1005_v6, 0.0 }
 0x325   :  { %v812_v8 = vsel %vm800_vm9, %v791_v7, 0.0 }
 0x326   :  { %v813_v44 = vadd.f32 %v812_v8, %v811_v5 }
 0x328   :  { %v815_v10 = vadd.f32 %v814_v3, %v813_v44 }
 0x32a   :  { %v816_v11 = vrot.slane %v815_v10, 4 }
 0x32c   :  { %v817_v14 = vadd.f32 %v816_v11, %v815_v10 }
 0x32e   :  { %v818_v15 = vrot.slane %v817_v14, 2 }
 0x330   :  { %v819_v13 = vadd.f32 %v818_v15, %v817_v14 }
 0x332   :  { %v820_v18 = vrot.slane %v819_v13, 1 }
 0x334   :  { %v821_v20 = vadd.f32 %v820_v18, %v819_v13 }
 0x336   :  { %v832_v23 = vadd.f32 %v831_v19, %v821_v20 }
 0x338   :  { %v833_v24 = vsub.f32 0.0, %v832_v23 }
 0x33a   :  { %v834_v4 = vmul.f32 1.442695, %v833_v24 }
 0x33c   :  { %1102 = vpow2.f32 %v834_v4 }
 0x346   :  { %v1103_v22 = vpop.eup %1102 }
 0x347   :  { %v836_v25 = vadd.f32 1.0, %v1103_v22 }
 0x349   :  { %1104 = vrcp.f32 %v836_v25 }
 0x353   :  { %v1105_v26 = vpop.eup %1104 }
 0x354   :  { %839 = vst.msk [vmem:[#allocation3] sm:$0x1] %vm838_vm10, %v1105_v26 }
 0x355   :  { %1117 = shalt.err (!%p1114_p4)
}
 0x356   :  { %s1118_s1 = scalar_lea.hbm %s1716_s8, 16 }
 0x357   :  { %p1119_p5 = scmp.ne.s32.totalorder %s1716_s8, %s1118_s1  ;;  %p1122_p6 = scmp.lt.u32.totalorder %s1118_s1, %s1716_s8 }
 0x359   :  { %p1124_p7 = pnand %p1122_p6, %p1119_p5 }
 0x35b   :  { %1127 = shalt.err (!%p1124_p7)
}
 0x35c   :  { %849 = dma.vmem_to_hbm [thread:$0]  %s847_s25, 16, %s1716_s8, [#allocation4]  }
 0x35d   :  { %1128 = dma.done.wait [#allocation4], 16  }
 0x35e   :  { %1129 = vsyncadd [#allocation4], 4294967280 }
 0x35f   :  { %853 = vsyncpa [#allocation4], 1 }

</bundles_post_ra>
